<compile_context>
chip_gen: v7x
topology: tpu7x:2x2x1
jax: 0.10.0
libtpu: 0.0.40
codegen_flags: <defaults>
</compile_context>

<pallas_src>
import functools

import jax
import jax.numpy as jnp
from jax.experimental import pallas as pl
from jax.experimental.pallas import tpu as pltpu

H1 = 256   # first hidden width == packed-buffer lane width (multiple of 128)
H2 = 64    # second hidden width (zero-padded up to H1 inside the packed buffer)


def _round_up(x, m):
    return (x + m - 1) // m * m


def pack_params(params):
    """Pack w1,b1,w2,b2,w3,b3 into one f32 (R, 256) buffer.

    Row layout (every segment starts on a multiple of 8 rows; zero fill outside
    the true extents keeps the padded math exact):
      [0,        F_pad)        w1  (F, 256)
      [F_pad,    +8)           b1  (row 0)
      [...,      +256)         w2  (256, 64)  in cols [0, 64)
      [...,      +8)           b2  (row 0, cols [0, 64))
      [...,      +256)         w3  (64, A)    in rows [0, 64), cols [0, A)
      [...,      +8)           b3  (row 0, cols [0, A))
    """
    w1, b1 = params["w1"], params["b1"]
    w2, b2 = params["w2"], params["b2"]
    w3, b3 = params["w3"], params["b3"]
    F = w1.shape[0]
    A = w3.shape[1]
    assert w1.shape[1] == H1 and w2.shape == (H1, H2) and w3.shape[0] == H2
    assert A <= H1
    F_pad = _round_up(F, 8)

    def seg(a, rows):
        buf = jnp.zeros((rows, H1), jnp.float32)
        return buf.at[: a.shape[0], : a.shape[1]].set(a.astype(jnp.float32))

    return jnp.concatenate(
        [
            seg(w1, F_pad),
            seg(b1.reshape(1, -1), 8),
            seg(w2, H1),
            seg(b2.reshape(1, -1), 8),
            seg(w3, H1),
            seg(b3.reshape(1, -1), 8),
        ],
        axis=0,
    )  # (F_pad + 536, 256)


def _make_kernel(F, F_pad, A, compute_dtype):
    # Static row offsets into the packed parameter buffer (free .at/[] slices).
    o_w1 = 0
    o_b1 = F_pad
    o_w2 = o_b1 + 8
    o_b2 = o_w2 + H1
    o_w3 = o_b2 + 8
    o_b3 = o_w3 + H1

    def kernel(x_ref, p_ref, o_ref):
        cd = compute_dtype
        x = x_ref[...].astype(cd)                          # (TB, F)
        w1 = p_ref[o_w1:o_w1 + F, :].astype(cd)            # (F, 256)
        b1 = p_ref[o_b1:o_b1 + 1, :]                       # (1, 256) f32
        w2 = p_ref[o_w2:o_w2 + H1, :].astype(cd)           # (256, 256) zero-padded
        b2 = p_ref[o_b2:o_b2 + 1, :]                       # (1, 256) f32
        w3 = p_ref[o_w3:o_w3 + H1, :].astype(cd)           # (256, 256) zero-padded
        b3 = p_ref[o_b3:o_b3 + 1, :]                       # (1, 256) f32

        # MXU matmuls with bf16 operands, f32 accumulation; bias/ReLU in f32.
        h1 = jnp.dot(x, w1, preferred_element_type=jnp.float32) + b1
        h1 = jnp.maximum(h1, 0.0)
        h2 = jnp.dot(h1.astype(cd), w2, preferred_element_type=jnp.float32) + b2
        h2 = jnp.maximum(h2, 0.0)                          # cols [64,256) are exactly 0
        q = jnp.dot(h2.astype(cd), w3, preferred_element_type=jnp.float32) + b3
        o_ref[...] = q[:, :A].astype(o_ref.dtype)

    return kernel


@functools.partial(
    jax.jit, static_argnames=("action_dim", "block_b", "compute_dtype"))
def network_forward(s, packed_params, *, action_dim, block_b=512,
                    compute_dtype=jnp.bfloat16):
    """Q-network forward pass as a single batch-tiled Pallas kernel.

    s:             (B, feature_dim) float32
    packed_params: output of pack_params(), f32 (F_pad + 536, 256)
    returns:       (B, action_dim) float32
    """
    B, F = s.shape
    A = action_dim
    F_pad = _round_up(F, 8)
    R = F_pad + 8 + H1 + 8 + H1 + 8
    assert packed_params.shape == (R, H1)

    # Prefer a large batch tile over deeper buffering / extra grid axes.
    tb = min(_round_up(block_b, 8), _round_up(B, 8))
    grid = (pl.cdiv(B, tb),)

    kernel = _make_kernel(F, F_pad, A, compute_dtype)

    return pl.pallas_call(
        kernel,
        out_shape=jax.ShapeDtypeStruct((B, A), jnp.float32),
        grid_spec=pltpu.PrefetchScalarGridSpec(
            num_scalar_prefetch=0,
            grid=grid,
            in_specs=[
                # Activations: tiled over the batch, double-buffered by Pallas.
                pl.BlockSpec((tb, F), lambda i: (i, 0)),
                # Packed weights: constant block index -> fetched once, resident.
                pl.BlockSpec((R, H1), lambda i: (0, 0)),
            ],
            out_specs=pl.BlockSpec((tb, A), lambda i: (i, 0)),
        ),
        compiler_params=pltpu.CompilerParams(
            dimension_semantics=("parallel",),   # shard batch across v7x's 2 TCs
            vmem_limit_bytes=32 * 1024 * 1024,   # explicit; fits v7x 64 MiB VMEM
        ),
    )(s, packed_params)


def init_params(key, feature_dim, action_dim):
    """Deterministic init mimicking nn.Linear's uniform(-1/sqrt(fan_in), ...)."""
    dims = [(feature_dim, H1), (H1, H2), (H2, action_dim)]
    params = {}
    for i, (fan_in, fan_out) in enumerate(dims, start=1):
        key, kw, kb = jax.random.split(key, 3)
        bound = 1.0 / jnp.sqrt(jnp.float32(fan_in))
        params[f"w{i}"] = jax.random.uniform(
            kw, (fan_in, fan_out), jnp.float32, -bound, bound)
        params[f"b{i}"] = jax.random.uniform(
            kb, (1, fan_out), jnp.float32, -bound, bound)
    return params


def reference_forward(s, p, compute_dtype=jnp.bfloat16):
    """Pure-JAX reference using the same precision recipe as the kernel."""
    cd = compute_dtype
    h1 = jnp.maximum(
        jnp.dot(s.astype(cd), p["w1"].astype(cd),
                preferred_element_type=jnp.float32) + p["b1"], 0.0)
    h2 = jnp.maximum(
        jnp.dot(h1.astype(cd), p["w2"].astype(cd),
                preferred_element_type=jnp.float32) + p["b2"], 0.0)
    return jnp.dot(h2.astype(cd), p["w3"].astype(cd),
                   preferred_element_type=jnp.float32) + p["b3"]


if __name__ == "__main__":
    feature_dim = 8     # small observation vector
    action_dim = 4      # number of discrete actions
    batch = 1024        # training-batch sized forward (B=2 inference calls are
                        # launch-bound; amortize by batching states per call)

    key = jax.random.PRNGKey(0)
    key, ks = jax.random.split(key)
    s = jax.random.normal(ks, (batch, feature_dim), jnp.float32)
    params = init_params(key, feature_dim, action_dim)
    packed = pack_params(params)

    q = network_forward(s, packed, action_dim=action_dim)   # grid = (2,) @ TB=512
    q = jax.block_until_ready(q)

    q_ref = reference_forward(s, params)
    assert q.shape == (batch, action_dim)
    assert jnp.allclose(q, q_ref, atol=1e-3, rtol=1e-3), float(
        jnp.max(jnp.abs(q - q_ref)))

    print("KERNEL_OK")
</pallas_src>

<mosaic_0001>
module attributes {stable_mosaic.version = 11 : i64} {
  func.func @kernel(%arg0: i32, %arg1: memref<512x8xf32, #tpu.memory_space<vmem>>, %arg2: memref<544x256xf32, #tpu.memory_space<vmem>>, %arg3: memref<512x4xf32, #tpu.memory_space<vmem>>) attributes {dimension_semantics = [#tpu.dimension_semantics<parallel>], iteration_bounds = array<i64: 2>, scalar_prefetch = 0 : i64, scratch_operands = 0 : i64, tpu.core_type = #tpu.core_type<tc>, window_params = [{transform_indices = @transform_0, window_bounds = array<i64: 512, 8>}, {pipeline_mode = #tpu.pipeline_mode<synchronous>, transform_indices = @transform_1, window_bounds = array<i64: 544, 256>}, {transform_indices = @transform_2, window_bounds = array<i64: 512, 4>}]} {
    %c0 = arith.constant 0 : index
    %c0_0 = arith.constant 0 : index
    %0 = vector.load %arg1[%c0, %c0_0] : memref<512x8xf32, #tpu.memory_space<vmem>>, vector<512x8xf32>
    %1 = arith.truncf %0 : vector<512x8xf32> to vector<512x8xbf16>
    %c0_1 = arith.constant 0 : index
    %c0_2 = arith.constant 0 : index
    %2 = vector.load %arg2[%c0_1, %c0_2] : memref<544x256xf32, #tpu.memory_space<vmem>>, vector<8x256xf32>
    %3 = arith.truncf %2 : vector<8x256xf32> to vector<8x256xbf16>
    %c8 = arith.constant 8 : index
    %c0_3 = arith.constant 0 : index
    %4 = vector.load %arg2[%c8, %c0_3] : memref<544x256xf32, #tpu.memory_space<vmem>>, vector<1x256xf32>
    %c16 = arith.constant 16 : index
    %c0_4 = arith.constant 0 : index
    %5 = vector.load %arg2[%c16, %c0_4] : memref<544x256xf32, #tpu.memory_space<vmem>>, vector<256x256xf32>
    %6 = arith.truncf %5 : vector<256x256xf32> to vector<256x256xbf16>
    %c272 = arith.constant 272 : index
    %c0_5 = arith.constant 0 : index
    %7 = vector.load %arg2[%c272, %c0_5] : memref<544x256xf32, #tpu.memory_space<vmem>>, vector<1x256xf32>
    %c280 = arith.constant 280 : index
    %c0_6 = arith.constant 0 : index
    %8 = vector.load %arg2[%c280, %c0_6] : memref<544x256xf32, #tpu.memory_space<vmem>>, vector<256x256xf32>
    %9 = arith.truncf %8 : vector<256x256xf32> to vector<256x256xbf16>
    %c536 = arith.constant 536 : index
    %c0_7 = arith.constant 0 : index
    %10 = vector.load %arg2[%c536, %c0_7] : memref<544x256xf32, #tpu.memory_space<vmem>>, vector<1x256xf32>
    %cst = arith.constant dense<0.000000e+00> : vector<512x256xf32>
    %11 = tpu.matmul %1, %3, %cst {dimension_numbers = #tpu.dot_dimension_numbers<[1], [0], [0], [1], [0, 0, 1, 1], [], []>} : vector<512x8xbf16>, vector<8x256xbf16>, vector<512x256xf32> -> vector<512x256xf32>
    %12 = vector.broadcast %4 : vector<1x256xf32> to vector<512x256xf32>
    %13 = arith.addf %11, %12 : vector<512x256xf32>
    %cst_8 = arith.constant 0.000000e+00 : f32
    %14 = vector.broadcast %cst_8 : f32 to vector<512x256xf32>
    %15 = arith.maximumf %13, %14 : vector<512x256xf32>
    %16 = arith.truncf %15 : vector<512x256xf32> to vector<512x256xbf16>
    %cst_9 = arith.constant dense<0.000000e+00> : vector<512x256xf32>
    %17 = tpu.matmul %16, %6, %cst_9 {dimension_numbers = #tpu.dot_dimension_numbers<[1], [0], [0], [1], [0, 0, 1, 1], [], []>} : vector<512x256xbf16>, vector<256x256xbf16>, vector<512x256xf32> -> vector<512x256xf32>
    %18 = vector.broadcast %7 : vector<1x256xf32> to vector<512x256xf32>
    %19 = arith.addf %17, %18 : vector<512x256xf32>
    %cst_10 = arith.constant 0.000000e+00 : f32
    %20 = vector.broadcast %cst_10 : f32 to vector<512x256xf32>
    %21 = arith.maximumf %19, %20 : vector<512x256xf32>
    %22 = arith.truncf %21 : vector<512x256xf32> to vector<512x256xbf16>
    %cst_11 = arith.constant dense<0.000000e+00> : vector<512x256xf32>
    %23 = tpu.matmul %22, %9, %cst_11 {dimension_numbers = #tpu.dot_dimension_numbers<[1], [0], [0], [1], [0, 0, 1, 1], [], []>} : vector<512x256xbf16>, vector<256x256xbf16>, vector<512x256xf32> -> vector<512x256xf32>
    %24 = vector.broadcast %10 : vector<1x256xf32> to vector<512x256xf32>
    %25 = arith.addf %23, %24 : vector<512x256xf32>
    %26 = vector.extract_strided_slice %25 {offsets = [0, 0], sizes = [512, 4], strides = [1, 1]} : vector<512x256xf32> to vector<512x4xf32>
    %c0_12 = arith.constant 0 : index
    %c0_13 = arith.constant 0 : index
    %27 = vector.load %arg3[%c0_12, %c0_13] : memref<512x4xf32, #tpu.memory_space<vmem>>, vector<512x4xf32>
    tpu.vector_store %arg3[%c0_12, %c0_13], %26 {strides = array<i32>} : memref<512x4xf32, #tpu.memory_space<vmem>>, vector<512x4xf32>,
    return
  }
  func.func @transform_0(%arg0: i32) -> (i32, i32) {
    %c0_i32 = arith.constant 0 : i32
    %c0_i32_0 = arith.constant 0 : i32
    return %arg0, %c0_i32 : i32, i32
  }
  func.func @transform_1(%arg0: i32) -> (i32, i32) {
    %c0_i32 = arith.constant 0 : i32
    %c0_i32_0 = arith.constant 0 : i32
    %c0_i32_1 = arith.constant 0 : i32
    return %c0_i32, %c0_i32_0 : i32, i32
  }
  func.func @transform_2(%arg0: i32) -> (i32, i32) {
    %c0_i32 = arith.constant 0 : i32
    %c0_i32_0 = arith.constant 0 : i32
    return %arg0, %c0_i32 : i32, i32
  }
}

</mosaic_0001>

<bundles_post_ra>
// kernel: network_forward.1
= control target key start
LH: loop header
LB: loop body
LE: loop exit
PB: predicated region body
PF: predicated region fallthrough
CT: control target
= control target key end

     0   :  { %s2160_s9 = smov 0   ;;  %s3282_s0 = inlined_call_operand.vmem [shape: f32[1024,8], index: 0, kind: input, shape index: {}]   ;;  %s3283_s1 = inlined_call_operand.vmem [shape: f32[544,256], index: 1, kind: input, shape index: {}]   ;;  %s3284_s2 = inlined_call_operand.vmem [shape: f32[1024,4], index: 2, kind: output, shape index: {}]  }
   0x1 LB: > { %s2078_s10 = sadd.s32 4294967295, %s2142_s9   ;;  %p2082_p0 = scmp.ge.s32.totalorder %s2142_s9, 1  ;;  %s2142_s9 = sphi %s2160_s9, %s12_s9  }
   0x2   : > { %p113_p1 = scmp.lt.s32.totalorder %s2142_s9, 3 }
   0x4   : > { %p114_p2 = pnand %p2082_p0, %p113_p1 }
   0x5   : > { %v245_v0 = vld [vmem:[%s3283_s1 + $0x8] sm:$0xff] (!%p114_p2)  ;;  %vm554_vm0 = vcmask (!%p114_p2), 1043456   ;;  %v244_v1 = vld [vmem:[%s3283_s1] sm:$0xff] (!%p114_p2)  ;;  %s2083_s15 = sshll.u32 (!%p114_p2), %s2078_s10, 6  ;;  %v2144_v4 = vmov (!%p114_p2), 0   ;;  %v253_v6 = vld [vmem:[%s3283_s1 + $0x38] sm:$0xff] (!%p114_p2) }
   0x6   : > { %117 = sbr.rel (%p114_p2) target bundleno = 928 (0x3a0), region = 28  ;;  %v247_v2 = vpack.c.bf16 (!%p114_p2), %v245_v0, %v245_v0  ;;  %v246_v3 = vpack.c.bf16 (!%p114_p2), %v244_v1, %v244_v1  ;;  %593 = vmatprep.mubr.bf16.mxu0 (!%p114_p2), %v2144_v4  ;;  %p136_p3 = scmp.lt.s32.totalorder (!%p114_p2), %s2083_s15, 127  ;;  %753 = vmatprep.mubr.bf16.mxu1 (!%p114_p2), %v2144_v4  ;;  %v251_v5 = vld [vmem:[%s3283_s1 + $0x28] sm:$0xff] (!%p114_p2)  ;;  %vm457_vm1 = vcmask (!%p114_p2), 64512   ;;  %v250_v14 = vld [vmem:[%s3283_s1 + $0x20] sm:$0xff] (!%p114_p2)  ;;  %v252_v15 = vld [vmem:[%s3283_s1 + $0x30] sm:$0xff] (!%p114_p2) }
   0x7   : > { %v315_v7 = vpack.c.bf16 (!%p114_p2), %v253_v6, %v251_v5  ;;  %v255_v16 = vld [vmem:[%s3283_s1 + $0x48] sm:$0xff] (!%p114_p2)  ;;  %v257_v17 = vld [vmem:[%s3283_s1 + $0x58] sm:$0xff] (!%p114_p2)  ;;  %v314_v21 = vpack.c.bf16 (!%p114_p2), %v252_v15, %v250_v14  ;;  %v254_v24 = vld [vmem:[%s3283_s1 + $0x40] sm:$0xff] (!%p114_p2)  ;;  %vm1957_vm2 = vcmask (!%p114_p2), 31744  }
   0x8   : > { %2090 = vmatprep.subr.msk.bf16.mxu0 (!%p114_p2), %vm554_vm0, %v247_v2  ;;  %v556_v8 = vsel (!%p114_p2), %vm554_vm0, %v246_v3, 0  ;;  %2125 = vmatprep.subr.msk.bf16.mxu1 (!%p114_p2), %vm554_vm0, %v247_v2  ;;  %v317_v23 = vpack.c.bf16 (!%p114_p2), %v257_v17, %v255_v16  ;;  %v256_v25 = vld [vmem:[%s3283_s1 + $0x50] sm:$0xff] (!%p114_p2)  ;;  %v259_v26 = vld [vmem:[%s3283_s1 + $0x68] sm:$0xff] (!%p114_p2)  ;;  %v261_v27 = vld [vmem:[%s3283_s1 + $0x78] sm:$0xff] (!%p114_p2) }
   0x9   : > { %562 = vmatpush1.bf16.msra.mxu0 (!%p114_p2), %v556_v8  ;;  %2126 = vmatpush1.bf16.msra.mxu1 (!%p114_p2), %v556_v8  ;;  %v316_v32 = vpack.c.bf16 (!%p114_p2), %v256_v25, %v254_v24  ;;  %v319_v33 = vpack.c.bf16 (!%p114_p2), %v261_v27, %v259_v26  ;;  %v258_v34 = vld [vmem:[%s3283_s1 + $0x60] sm:$0xff] (!%p114_p2)  ;;  %v260_v35 = vld [vmem:[%s3283_s1 + $0x70] sm:$0xff] (!%p114_p2)  ;;  %v263_v38 = vld [vmem:[%s3283_s1 + $0x88] sm:$0xff] (!%p114_p2) }
   0xa   : > { %1117 = vmatprep.subr.bf16.mxu1 (!%p114_p2), %v315_v7  ;;  %v265_v39 = vld [vmem:[%s3283_s1 + $0x98] sm:$0xff] (!%p114_p2)  ;;  %v318_v40 = vpack.c.bf16 (!%p114_p2), %v260_v35, %v258_v34  ;;  %v262_v42 = vld [vmem:[%s3283_s1 + $0x80] sm:$0xff] (!%p114_p2)  ;;  %v264_v43 = vld [vmem:[%s3283_s1 + $0x90] sm:$0xff] (!%p114_p2) }
   0xb   : > { %v321_v41 = vpack.c.bf16 (!%p114_p2), %v265_v39, %v263_v38  ;;  %v267_v45 = vld [vmem:[%s3283_s1 + $0xa8] sm:$0xff] (!%p114_p2)  ;;  %v269_v46 = vld [vmem:[%s3283_s1 + $0xb8] sm:$0xff] (!%p114_p2)  ;;  %v320_v50 = vpack.c.bf16 (!%p114_p2), %v264_v43, %v262_v42  ;;  %v266_v52 = vld [vmem:[%s3283_s1 + $0xa0] sm:$0xff] (!%p114_p2) }
   0xc   : > { %v323_v51 = vpack.c.bf16 (!%p114_p2), %v269_v46, %v267_v45  ;;  %v268_v53 = vld [vmem:[%s3283_s1 + $0xb0] sm:$0xff] (!%p114_p2)  ;;  %v271_v56 = vld [vmem:[%s3283_s1 + $0xc8] sm:$0xff] (!%p114_p2)  ;;  %v273_v57 = vld [vmem:[%s3283_s1 + $0xd8] sm:$0xff] (!%p114_p2) }
   0xd   : > { %s3286_s15 = smov (!%p136_p3, %s2083_s15), 127  ;;  %v322_v58 = vpack.c.bf16 %v268_v53, %v266_v52  ;;  %v325_v59 = vpack.c.bf16 %v273_v57, %v271_v56  ;;  %v270_v60 = vld [vmem:[%s3283_s1 + $0xc0] sm:$0xff]  ;;  %v272_v61 = vld [vmem:[%s3283_s1 + $0xd0] sm:$0xff]  ;;  %v275_v63 = vld [vmem:[%s3283_s1 + $0xe8] sm:$0xff] }
   0xe   : > { %s2084_s20 = sshll.u32 %s3286_s15, 3  ;;  %v277_v0 = vld [vmem:[%s3283_s1 + $0xf8] sm:$0xff]  ;;  %v324_v5 = vpack.c.bf16 %v272_v61, %v270_v60  ;;  %v274_v7 = vld [vmem:[%s3283_s1 + $0xe0] sm:$0xff]  ;;  %v276_v8 = vld [vmem:[%s3283_s1 + $0xf0] sm:$0xff] }
   0xf   : > { %s2190_s23 = scalar_lea.vmem %s3282_s0, %s2084_s20  ;;  %v327_v6 = vpack.c.bf16 %v277_v0, %v275_v63  ;;  %v278_v15 = vld [vmem:[%s3283_s1 + $0x100] sm:$0xff]  ;;  %v280_v16 = vld [vmem:[%s3283_s1 + $0x110] sm:$0xff]  ;;  %s3069_s11 = scalar_lea.vmem %s3284_s2, %s2084_s20 }
  0x10   : > { %v148_v9 = vld [vmem:[%s2190_s23] sm:$0xff]  ;;  %v149_v10 = vld [vmem:[%s2190_s23 + $0x8] sm:$0xff]  ;;  %v150_v12 = vld [vmem:[%s2190_s23 + $0x10] sm:$0xff] }
  0x11   : > { %v212_v11 = vpack.c.bf16 %v149_v10, %v148_v9  ;;  %v151_v13 = vld [vmem:[%s2190_s23 + $0x18] sm:$0xff]  ;;  %v180_v19 = vld [vmem:[%s2190_s23 + $0x100] sm:$0xff]  ;;  %v181_v20 = vld [vmem:[%s2190_s23 + $0x108] sm:$0xff] }
  0x12   : > { %v213_v18 = vpack.c.bf16 %v151_v13, %v150_v12  ;;  %v228_v22 = vpack.c.bf16 %v181_v20, %v180_v19  ;;  %v152_v28 = vld [vmem:[%s2190_s23 + $0x20] sm:$0xff]  ;;  %v153_v29 = vld [vmem:[%s2190_s23 + $0x28] sm:$0xff]  ;;  %v182_v30 = vld [vmem:[%s2190_s23 + $0x110] sm:$0xff]  ;;  %v326_v13 = vpack.c.bf16 %v276_v8, %v274_v7 }
  0x13   : > { %2091 = vmatmul.mubr.msk.bf16.vlgmr.msra.gmra.mrb[0].mxu0 %vm457_vm1, %v212_v11  ;;  %v183_v31 = vld [vmem:[%s2190_s23 + $0x118] sm:$0xff]  ;;  %v214_v36 = vpack.c.bf16 %v153_v29, %v152_v28  ;;  %v154_v44 = vld [vmem:[%s2190_s23 + $0x30] sm:$0xff]  ;;  %v184_v48 = vld [vmem:[%s2190_s23 + $0x120] sm:$0xff] }
  0x14   : > { %603 = vmatprep.mubr.bf16.mxu0 %v2144_v4  ;;  %2107 = vmatmul.mubr.msk.bf16.vlgmr.msra.gmra.mrb[0].mxu1 %vm457_vm1, %v228_v22  ;;  %v229_v37 = vpack.c.bf16 %v183_v31, %v182_v30  ;;  %v155_v47 = vld [vmem:[%s2190_s23 + $0x38] sm:$0xff]  ;;  %v185_v49 = vld [vmem:[%s2190_s23 + $0x128] sm:$0xff]  ;;  %v156_v62 = vld [vmem:[%s2190_s23 + $0x40] sm:$0xff] }
  0x15   : > { %1118 = vmatpush1.bf16.msra.mxu1 %v314_v21  ;;  %763 = vmatprep.mubr.bf16.mxu1 %v2144_v4  ;;  %v215_v54 = vpack.c.bf16 %v155_v47, %v154_v44  ;;  %v230_v55 = vpack.c.bf16 %v185_v49, %v184_v48  ;;  %v157_v1 = vld [vmem:[%s2190_s23 + $0x48] sm:$0xff]  ;;  %v186_v2 = vld [vmem:[%s2190_s23 + $0x130] sm:$0xff]  ;;  %v187_v3 = vld [vmem:[%s2190_s23 + $0x138] sm:$0xff] }
  0x16   : > { %1119 = vmatprep.subr.bf16.mxu1 %v317_v23  ;;  %v216_v9 = vpack.c.bf16 %v157_v1, %v156_v62  ;;  %v231_v10 = vpack.c.bf16 %v187_v3, %v186_v2  ;;  %v279_v11 = vld [vmem:[%s3283_s1 + $0x108] sm:$0xff]  ;;  %v281_v12 = vld [vmem:[%s3283_s1 + $0x118] sm:$0xff]  ;;  %v158_v17 = vld [vmem:[%s2190_s23 + $0x50] sm:$0xff]  ;;  %v328_v23 = vpack.c.bf16 %v280_v16, %v278_v15 }
  0x17   : > { %v329_v14 = vpack.c.bf16 %v281_v12, %v279_v11  ;;  %v285_v19 = vld [vmem:[%s3283_s1 + $0x138] sm:$0xff]  ;;  %v188_v21 = vld [vmem:[%s2190_s23 + $0x140] sm:$0xff]  ;;  %v189_v22 = vld [vmem:[%s2190_s23 + $0x148] sm:$0xff] }
  0x18   : > { %v159_v20 = vld [vmem:[%s2190_s23 + $0x58] sm:$0xff]  ;;  %v282_v25 = vld [vmem:[%s3283_s1 + $0x120] sm:$0xff]  ;;  %v284_v26 = vld [vmem:[%s3283_s1 + $0x130] sm:$0xff]  ;;  %v232_v28 = vpack.c.bf16 %v189_v22, %v188_v21 }
  0x19   : > { %1120 = vmatpush1.bf16.msra.mxu1 %v316_v32  ;;  %v217_v27 = vpack.c.bf16 %v159_v20, %v158_v17  ;;  %v287_v29 = vld [vmem:[%s3283_s1 + $0x148] sm:$0xff]  ;;  %v289_v30 = vld [vmem:[%s3283_s1 + $0x158] sm:$0xff]  ;;  %v330_v31 = vpack.c.bf16 %v284_v26, %v282_v25  ;;  %v288_v34 = vld [vmem:[%s3283_s1 + $0x150] sm:$0xff] }
  0x1a   : > { %1121 = vmatprep.subr.bf16.mxu1 %v319_v33  ;;  %v333_v32 = vpack.c.bf16 %v289_v30, %v287_v29  ;;  %v286_v33 = vld [vmem:[%s3283_s1 + $0x140] sm:$0xff]  ;;  %v161_v38 = vld [vmem:[%s2190_s23 + $0x68] sm:$0xff]  ;;  %v190_v39 = vld [vmem:[%s2190_s23 + $0x150] sm:$0xff] }
  0x1b   : > { %2092 = vmatmul.mubr.msk.bf16.gmra.mrb[4].mxu0 %vm457_vm1, %v213_v18  ;;  %v283_v18 = vld [vmem:[%s3283_s1 + $0x128] sm:$0xff]  ;;  %v160_v35 = vld [vmem:[%s2190_s23 + $0x60] sm:$0xff]  ;;  %v292_v44 = vld [vmem:[%s3283_s1 + $0x170] sm:$0xff] }
  0x1c   : > { %613 = vmatprep.mubr.bf16.mxu0 %v2144_v4  ;;  %2108 = vmatmul.mubr.msk.bf16.gmra.mrb[4].mxu1 %vm457_vm1, %v229_v37  ;;  %v331_v24 = vpack.c.bf16 %v285_v19, %v283_v18  ;;  %v293_v37 = vld [vmem:[%s3283_s1 + $0x178] sm:$0xff]  ;;  %v290_v43 = vld [vmem:[%s3283_s1 + $0x160] sm:$0xff]  ;;  %v218_v45 = vpack.c.bf16 %v161_v38, %v160_v35  ;;  %v295_v47 = vld [vmem:[%s3283_s1 + $0x188] sm:$0xff] }
  0x1d   : > { %773 = vmatprep.mubr.bf16.mxu1 %v2144_v4  ;;  %1122 = vmatpush1.bf16.msra.mxu1 %v318_v40  ;;  %v191_v40 = vld [vmem:[%s2190_s23 + $0x158] sm:$0xff]  ;;  %v334_v49 = vpack.c.bf16 %v292_v44, %v290_v43  ;;  %v296_v52 = vld [vmem:[%s3283_s1 + $0x190] sm:$0xff]  ;;  %v192_v57 = vld [vmem:[%s2190_s23 + $0x160] sm:$0xff] }
  0x1e   : > { %1123 = vmatprep.subr.bf16.mxu1 %v321_v41  ;;  %v332_v41 = vpack.c.bf16 %v288_v34, %v286_v33  ;;  %v233_v46 = vpack.c.bf16 %v191_v40, %v190_v39  ;;  %v297_v48 = vld [vmem:[%s3283_s1 + $0x198] sm:$0xff]  ;;  %v162_v53 = vld [vmem:[%s2190_s23 + $0x70] sm:$0xff]  ;;  %v298_v61 = vld [vmem:[%s3283_s1 + $0x1a0] sm:$0xff] }
  0x1f   : > { %v163_v56 = vld [vmem:[%s2190_s23 + $0x78] sm:$0xff]  ;;  %v300_v62 = vld [vmem:[%s3283_s1 + $0x1b0] sm:$0xff]  ;;  %v303_v1 = vld [vmem:[%s3283_s1 + $0x1c8] sm:$0xff] }
  0x20   : > { %v219_v63 = vpack.c.bf16 %v163_v56, %v162_v53  ;;  %v305_v2 = vld [vmem:[%s3283_s1 + $0x1d8] sm:$0xff]  ;;  %v338_v3 = vpack.c.bf16 %v300_v62, %v298_v61  ;;  %v304_v7 = vld [vmem:[%s3283_s1 + $0x1d0] sm:$0xff]  ;;  %v164_v8 = vld [vmem:[%s2190_s23 + $0x80] sm:$0xff] }
  0x21   : > { %1124 = vmatpush1.bf16.msra.mxu1 %v320_v50  ;;  %v337_v50 = vpack.c.bf16 %v297_v48, %v295_v47  ;;  %v165_v11 = vld [vmem:[%s2190_s23 + $0x88] sm:$0xff]  ;;  %v194_v12 = vld [vmem:[%s2190_s23 + $0x170] sm:$0xff]  ;;  %v306_v16 = vld [vmem:[%s3283_s1 + $0x1e0] sm:$0xff] }
  0x22   : > { %1125 = vmatprep.subr.bf16.mxu1 %v323_v51  ;;  %v294_v51 = vld [vmem:[%s3283_s1 + $0x180] sm:$0xff]  ;;  %v308_v17 = vld [vmem:[%s3283_s1 + $0x1f0] sm:$0xff]  ;;  %v220_v18 = vpack.c.bf16 %v165_v11, %v164_v8  ;;  %v167_v22 = vld [vmem:[%s2190_s23 + $0x98] sm:$0xff] }
  0x23   : > { %2093 = vmatmul.mubr.msk.bf16.gmra.mrb[8].mxu0 %vm457_vm1, %v214_v36  ;;  %v291_v36 = vld [vmem:[%s3283_s1 + $0x168] sm:$0xff]  ;;  %v342_v20 = vpack.c.bf16 %v308_v17, %v306_v16  ;;  %v166_v21 = vld [vmem:[%s2190_s23 + $0x90] sm:$0xff]  ;;  %v199_v30 = vld [vmem:[%s2190_s23 + $0x198] sm:$0xff] }
  0x24   : > { %623 = vmatprep.mubr.bf16.mxu0 %v2144_v4  ;;  %2109 = vmatmul.mubr.msk.bf16.gmra.mrb[8].mxu1 %vm457_vm1, %v230_v55  ;;  %v335_v42 = vpack.c.bf16 %v293_v37, %v291_v36  ;;  %v301_v55 = vld [vmem:[%s3283_s1 + $0x1b8] sm:$0xff]  ;;  %v221_v25 = vpack.c.bf16 %v167_v22, %v166_v21  ;;  %v198_v29 = vld [vmem:[%s2190_s23 + $0x190] sm:$0xff]  ;;  %v200_v35 = vld [vmem:[%s2190_s23 + $0x1a0] sm:$0xff] }
  0x25   : > { %783 = vmatprep.mubr.bf16.mxu1 %v2144_v4  ;;  %1126 = vmatpush1.bf16.msra.mxu1 %v322_v58  ;;  %v193_v58 = vld [vmem:[%s2190_s23 + $0x168] sm:$0xff]  ;;  %v170_v33 = vld [vmem:[%s2190_s23 + $0xb0] sm:$0xff]  ;;  %v171_v34 = vld [vmem:[%s2190_s23 + $0xb8] sm:$0xff] }
  0x26   : > { %1127 = vmatprep.subr.bf16.mxu1 %v325_v59  ;;  %v336_v59 = vpack.c.bf16 %v296_v52, %v294_v51  ;;  %v234_v0 = vpack.c.bf16 %v193_v58, %v192_v57  ;;  %v201_v36 = vld [vmem:[%s2190_s23 + $0x1a8] sm:$0xff]  ;;  %v223_v37 = vpack.c.bf16 %v171_v34, %v170_v33  ;;  %v313_v40 = vld [vmem:[%s3283_s1 + $0x218] sm:$0xff]  ;;  %v310_v43 = vld [vmem:[%s3283_s1 + $0x200] sm:$0xff] }
  0x27   : > { %v238_v38 = vpack.c.bf16 %v201_v36, %v200_v35  ;;  %v311_v39 = vld [vmem:[%s3283_s1 + $0x208] sm:$0xff]  ;;  %v312_v44 = vld [vmem:[%s3283_s1 + $0x210] sm:$0xff]  ;;  %v203_v47 = vld [vmem:[%s2190_s23 + $0x1b8] sm:$0xff] }
  0x28   : > { %v344_v48 = vpack.c.bf16 %v312_v44, %v310_v43  ;;  %v174_v51 = vld [vmem:[%s2190_s23 + $0xd0] sm:$0xff]  ;;  %v175_v52 = vld [vmem:[%s2190_s23 + $0xd8] sm:$0xff]  ;;  %v204_v53 = vld [vmem:[%s2190_s23 + $0x1c0] sm:$0xff] }
  0x29   : > { %1128 = vmatpush1.bf16.msra.mxu1 %v324_v5  ;;  %v341_v5 = vpack.c.bf16 %v305_v2, %v303_v1  ;;  %v176_v57 = vld [vmem:[%s2190_s23 + $0xe0] sm:$0xff]  ;;  %v177_v58 = vld [vmem:[%s2190_s23 + $0xe8] sm:$0xff]  ;;  %v361_v34 = vld [vmem:[%s3283_s1 + $0x298] sm:$0xff] }
  0x2a   : > { %1129 = vmatprep.subr.bf16.mxu1 %v327_v6  ;;  %v302_v6 = vld [vmem:[%s3283_s1 + $0x1c0] sm:$0xff]  ;;  %v226_v61 = vpack.c.bf16 %v177_v58, %v176_v57  ;;  %v209_v2 = vld [vmem:[%s2190_s23 + $0x1e8] sm:$0xff]  ;;  %v360_v36 = vld [vmem:[%s3283_s1 + $0x290] sm:$0xff] }
  0x2b   : > { %2094 = vmatmul.mubr.msk.bf16.gmra.mrb[12].mxu0 %vm457_vm1, %v215_v54  ;;  %v299_v54 = vld [vmem:[%s3283_s1 + $0x1a8] sm:$0xff]  ;;  %v208_v1 = vld [vmem:[%s2190_s23 + $0x1e0] sm:$0xff] }
  0x2c   : > { %633 = vmatprep.mubr.bf16.mxu0 %v2144_v4  ;;  %2110 = vmatmul.mubr.msk.bf16.gmra.mrb[12].mxu1 %vm457_vm1, %v231_v10  ;;  %v339_v60 = vpack.c.bf16 %v301_v55, %v299_v54  ;;  %v309_v10 = vld [vmem:[%s3283_s1 + $0x1f8] sm:$0xff]  ;;  %v205_v54 = vld [vmem:[%s2190_s23 + $0x1c8] sm:$0xff]  ;;  %v225_v55 = vpack.c.bf16 %v175_v52, %v174_v51 }
  0x2d   : > { %793 = vmatprep.mubr.bf16.mxu1 %v2144_v4  ;;  %1130 = vmatpush1.bf16.msra.mxu1 %v326_v13  ;;  %v195_v13 = vld [vmem:[%s2190_s23 + $0x178] sm:$0xff]  ;;  %v240_v56 = vpack.c.bf16 %v205_v54, %v204_v53  ;;  %v355_v16 = vld [vmem:[%s3283_s1 + $0x268] sm:$0xff]  ;;  %v366_v53 = vld [vmem:[%s3283_s1 + $0x2c0] sm:$0xff] }
  0x2e   : > { %1131 = vmatprep.subr.bf16.mxu1 %v329_v14  ;;  %v340_v14 = vpack.c.bf16 %v304_v7, %v302_v6  ;;  %v235_v19 = vpack.c.bf16 %v195_v13, %v194_v12  ;;  %v210_v6 = vld [vmem:[%s2190_s23 + $0x1f0] sm:$0xff]  ;;  %v211_v7 = vld [vmem:[%s2190_s23 + $0x1f8] sm:$0xff]  ;;  %v363_v35 = vld [vmem:[%s3283_s1 + $0x2a8] sm:$0xff] }
  0x2f   : > { %v243_v8 = vpack.c.bf16 %v211_v7, %v210_v6  ;;  %v348_v12 = vld [vmem:[%s3283_s1 + $0x230] sm:$0xff] }
  0x31   : > { %1132 = vmatpush1.bf16.msra.mxu1 %v328_v23  ;;  %v196_v23 = vld [vmem:[%s2190_s23 + $0x180] sm:$0xff] }
  0x32   : > { %1133 = vmatprep.subr.bf16.mxu1 %v331_v24  ;;  %v197_v24 = vld [vmem:[%s2190_s23 + $0x188] sm:$0xff] }
  0x33   : > { %2095 = vmatmul.mubr.msk.bf16.gmra.mrb[16].mxu0 %vm457_vm1, %v216_v9  ;;  %v307_v9 = vld [vmem:[%s3283_s1 + $0x1e8] sm:$0xff]  ;;  %v236_v26 = vpack.c.bf16 %v197_v24, %v196_v23  ;;  %v2087_v23 = vld [vmem:[%s3283_s1 + $0x10] ss:$8 sm:$0x3] }
  0x34   : > { %643 = vmatprep.mubr.bf16.mxu0 %v2144_v4  ;;  %2111 = vmatmul.mubr.msk.bf16.gmra.mrb[16].mxu1 %vm457_vm1, %v232_v28  ;;  %v343_v15 = vpack.c.bf16 %v309_v10, %v307_v9  ;;  %v169_v28 = vld [vmem:[%s2190_s23 + $0xa8] sm:$0xff]  ;;  %v349_v9 = vld [vmem:[%s3283_s1 + $0x238] sm:$0xff] }
  0x35   : > { %803 = vmatprep.mubr.bf16.mxu1 %v2144_v4  ;;  %1134 = vmatpush1.bf16.msra.mxu1 %v330_v31  ;;  %v351_v10 = vld [vmem:[%s3283_s1 + $0x248] sm:$0xff] }
  0x36   : > { %1135 = vmatprep.subr.bf16.mxu1 %v333_v32  ;;  %v237_v32 = vpack.c.bf16 %v199_v30, %v198_v29  ;;  %v413_v11 = vpack.c.bf16 %v351_v10, %v349_v9  ;;  %v358_v29 = vld [vmem:[%s3283_s1 + $0x280] sm:$0xff] }
  0x38   : > { %1668 = vmatprep.subr.bf16.mxu0 %v413_v11 }
  0x39   : > { %1136 = vmatpush1.bf16.msra.mxu1 %v332_v41  ;;  %v172_v41 = vld [vmem:[%s2190_s23 + $0xc0] sm:$0xff] }
  0x3a   : > { %1137 = vmatprep.subr.bf16.mxu1 %v335_v42  ;;  %v345_v42 = vpack.c.bf16 %v313_v40, %v311_v39  ;;  %v419_v39 = vpack.c.bf16 %v363_v35, %v361_v34  ;;  %v362_v40 = vld [vmem:[%s3283_s1 + $0x2a0] sm:$0xff] }
  0x3b   : > { %2096 = vmatmul.mubr.msk.bf16.gmra.mrb[20].mxu0 %vm457_vm1, %v217_v27  ;;  %v168_v27 = vld [vmem:[%s2190_s23 + $0xa0] sm:$0xff]  ;;  %v418_v43 = vpack.c.bf16 %v362_v40, %v360_v36 }
  0x3c   : > { %653 = vmatprep.mubr.bf16.mxu0 %v2144_v4  ;;  %2112 = vmatmul.mubr.msk.bf16.gmra.mrb[20].mxu1 %vm457_vm1, %v233_v46  ;;  %v222_v31 = vpack.c.bf16 %v169_v28, %v168_v27  ;;  %v202_v46 = vld [vmem:[%s2190_s23 + $0x1b0] sm:$0xff] }
  0x3d   : > { %813 = vmatprep.mubr.bf16.mxu1 %v2144_v4  ;;  %1138 = vmatpush1.bf16.msra.mxu1 %v334_v49  ;;  %v356_v28 = vld [vmem:[%s3283_s1 + $0x270] sm:$0xff] }
  0x3e   : > { %1139 = vmatprep.subr.bf16.mxu1 %v337_v50  ;;  %v239_v50 = vpack.c.bf16 %v203_v47, %v202_v46  ;;  %v365_v47 = vld [vmem:[%s3283_s1 + $0x2b8] sm:$0xff] }
  0x41   : > { %1140 = vmatpush1.bf16.msra.mxu1 %v336_v59  ;;  %v206_v59 = vld [vmem:[%s2190_s23 + $0x1d0] sm:$0xff] }
  0x42   : > { %1141 = vmatprep.subr.bf16.mxu1 %v339_v60  ;;  %v207_v60 = vld [vmem:[%s2190_s23 + $0x1d8] sm:$0xff] }
  0x43   : > { %2097 = vmatmul.mubr.msk.bf16.gmra.mrb[24].mxu0 %vm457_vm1, %v218_v45  ;;  %v173_v45 = vld [vmem:[%s2190_s23 + $0xc8] sm:$0xff]  ;;  %v241_v62 = vpack.c.bf16 %v207_v60, %v206_v59 }
  0x44   : > { %663 = vmatprep.mubr.bf16.mxu0 %v2144_v4  ;;  %2113 = vmatmul.mubr.msk.bf16.gmra.mrb[24].mxu1 %vm457_vm1, %v234_v0  ;;  %v224_v49 = vpack.c.bf16 %v173_v45, %v172_v41  ;;  %v179_v0 = vld [vmem:[%s2190_s23 + $0xf8] sm:$0xff] }
  0x45   : > { %823 = vmatprep.mubr.bf16.mxu1 %v2144_v4  ;;  %1142 = vmatpush1.bf16.msra.mxu1 %v338_v3 }
  0x46   : > { %1143 = vmatprep.subr.bf16.mxu1 %v341_v5  ;;  %v242_v5 = vpack.c.bf16 %v209_v2, %v208_v1 }
  0x49   : > { %1144 = vmatpush1.bf16.msra.mxu1 %v340_v14  ;;  %v447_v14 = vlaneseq }
  0x4a   : > { %1145 = vmatprep.subr.bf16.mxu1 %v343_v15  ;;  %v353_v15 = vld [vmem:[%s3283_s1 + $0x258] sm:$0xff] }
  0x4b   : > { %2098 = vmatmul.mubr.msk.bf16.gmra.mrb[28].mxu0 %vm457_vm1, %v219_v63  ;;  %v178_v63 = vld [vmem:[%s2190_s23 + $0xf0] sm:$0xff]  ;;  %v415_v17 = vpack.c.bf16 %v355_v16, %v353_v15 }
  0x4c   : > { %673 = vmatprep.mubr.bf16.mxu0 %v2144_v4  ;;  %2114 = vmatmul.mubr.msk.bf16.gmra.mrb[28].mxu1 %vm457_vm1, %v235_v19  ;;  %v227_v3 = vpack.c.bf16 %v179_v0, %v178_v63  ;;  %v354_v19 = vld [vmem:[%s3283_s1 + $0x260] sm:$0xff]  ;;  %v368_v15 = vld [vmem:[%s3283_s1 + $0x2d0] sm:$0xff] }
  0x4d   : > { %833 = vmatprep.mubr.bf16.mxu1 %v2144_v4  ;;  %1146 = vmatpush1.bf16.msra.mxu1 %v342_v20  ;;  %v2528_v20 = vshrl.u32 %v447_v14, 7  ;;  %v371_v14 = vld [vmem:[%s3283_s1 + $0x2e8] sm:$0xff] }
  0x4e   : > { %1147 = vmatprep.subr.bf16.mxu1 %v345_v42 }
  0x4f   : > { %v2531_v22 = vsub.s32 0, %v2528_v20  ;;  %v453_v24 = vsub.s32 1, %v2528_v20 }
  0x51   : > { %1148 = vmatpush1.bf16.msra.mxu1 %v344_v48  ;;  %v2550_v30 = vrot.slane %v2087_v23, %v2531_v22  ;;  %v367_v48 = vld [vmem:[%s3283_s1 + $0x2c8] sm:$0xff] }
  0x52   : > { %v421_v52 = vpack.c.bf16 %v367_v48, %v365_v47 }
  0x53   : > { %2099 = vmatmul.mubr.msk.bf16.gmra.mrb[32].mxu0 %vm457_vm1, %v220_v18  ;;  %v352_v18 = vld [vmem:[%s3283_s1 + $0x250] sm:$0xff] }
  0x54   : > { %683 = vmatprep.mubr.bf16.mxu0 %v2144_v4  ;;  %2115 = vmatmul.mubr.msk.bf16.gmra.mrb[32].mxu1 %vm457_vm1, %v236_v26  ;;  %v414_v21 = vpack.c.bf16 %v354_v19, %v352_v18  ;;  %v359_v26 = vld [vmem:[%s3283_s1 + $0x288] sm:$0xff] }
  0x55   : > { %843 = vmatprep.mubr.bf16.mxu1 %v2144_v4 }
  0x5b   : > { %2100 = vmatmul.mubr.msk.bf16.gmra.mrb[36].mxu0 %vm457_vm1, %v221_v25  ;;  %v357_v25 = vld [vmem:[%s3283_s1 + $0x278] sm:$0xff] }
  0x5c   : > { %693 = vmatprep.mubr.bf16.mxu0 %v2144_v4  ;;  %2116 = vmatmul.mubr.msk.bf16.gmra.mrb[36].mxu1 %vm457_vm1, %v237_v32  ;;  %v417_v27 = vpack.c.bf16 %v359_v26, %v357_v25  ;;  %v2554_v32 = vrot.slane %v2087_v23, %v453_v24 }
  0x5d   : > { %853 = vmatprep.mubr.bf16.mxu1 %v2144_v4 }
  0x63   : > { %2101 = vmatmul.mubr.msk.bf16.gmra.mrb[40].mxu0 %vm457_vm1, %v222_v31  ;;  %v416_v31 = vpack.c.bf16 %v358_v29, %v356_v28 }
  0x64   : > { %703 = vmatprep.mubr.bf16.mxu0 %v2144_v4  ;;  %2117 = vmatmul.mubr.msk.bf16.gmra.mrb[40].mxu1 %vm457_vm1, %v238_v38 }
  0x65   : > { %863 = vmatprep.mubr.bf16.mxu1 %v2144_v4 }
  0x6b   : > { %2102 = vmatmul.mubr.msk.bf16.gmra.mrb[44].mxu0 %vm457_vm1, %v223_v37 }
  0x6c   : > { %713 = vmatprep.mubr.bf16.mxu0 %v2144_v4  ;;  %2118 = vmatmul.mubr.msk.bf16.gmra.mrb[44].mxu1 %vm457_vm1, %v239_v50 }
  0x6d   : > { %873 = vmatprep.mubr.bf16.mxu1 %v2144_v4 }
  0x73   : > { %2103 = vmatmul.mubr.msk.bf16.gmra.mrb[48].mxu0 %vm457_vm1, %v224_v49  ;;  %v364_v49 = vld [vmem:[%s3283_s1 + $0x2b0] sm:$0xff] }
  0x74   : > { %723 = vmatprep.mubr.bf16.mxu0 %v2144_v4  ;;  %2119 = vmatmul.mubr.msk.bf16.gmra.mrb[48].mxu1 %vm457_vm1, %v240_v56  ;;  %v420_v56 = vpack.c.bf16 %v366_v53, %v364_v49  ;;  %v375_v53 = vld [vmem:[%s3283_s1 + $0x308] sm:$0xff] }
  0x75   : > { %883 = vmatprep.mubr.bf16.mxu1 %v2144_v4 }
  0x7b   : > { %2104 = vmatmul.mubr.msk.bf16.gmra.mrb[52].mxu0 %vm457_vm1, %v225_v55 }
  0x7c   : > { %733 = vmatprep.mubr.bf16.mxu0 %v2144_v4  ;;  %2120 = vmatmul.mubr.msk.bf16.gmra.mrb[52].mxu1 %vm457_vm1, %v241_v62 }
  0x7d   : > { %893 = vmatprep.mubr.bf16.mxu1 %v2144_v4 }
  0x83   : > { %2105 = vmatmul.mubr.msk.bf16.gmra.mrb[56].mxu0 %vm457_vm1, %v226_v61 }
  0x84   : > { %743 = vmatprep.mubr.bf16.mxu0 %v2144_v4  ;;  %2121 = vmatmul.mubr.msk.bf16.gmra.mrb[56].mxu1 %vm457_vm1, %v242_v5 }
  0x85   : > { %903 = vmatprep.mubr.bf16.mxu1 %v2144_v4  ;;  %v350_v4 = vld [vmem:[%s3283_s1 + $0x240] sm:$0xff] }
  0x86   : > { %v412_v13 = vpack.c.bf16 %v350_v4, %v348_v12 }
  0x88   : > { %1669 = vmatpush1.bf16.msra.mxu0 %v412_v13  ;;  %v369_v13 = vld [vmem:[%s3283_s1 + $0x2d8] sm:$0xff] }
  0x89   : > { %1670 = vmatprep.subr.bf16.mxu0 %v415_v17  ;;  %v423_v19 = vpack.c.bf16 %v371_v14, %v369_v13 }
  0x8b   : > { %2106 = vmatmul.mubr.msk.bf16.gmra.mrb[60].mxu0 %vm457_vm1, %v227_v3 }
  0x8c   : > { %2122 = vmatmul.mubr.msk.bf16.gmra.mrb[60].mxu1 %vm457_vm1, %v243_v8  ;;  %1671 = vmatpush1.bf16.msra.mxu0 %v414_v21  ;;  %v370_v21 = vld [vmem:[%s3283_s1 + $0x2e0] sm:$0xff] }
  0x8d   : > { %1672 = vmatprep.subr.bf16.mxu0 %v417_v27  ;;  %v422_v27 = vpack.c.bf16 %v370_v21, %v368_v15 }
  0x90   : > { %1673 = vmatpush1.bf16.msra.mxu0 %v416_v31 }
  0x91   : > { %1674 = vmatprep.subr.bf16.mxu0 %v419_v39 }
  0x94   : > { %1675 = vmatpush1.bf16.msra.mxu0 %v418_v43 }
  0x95   : > { %1676 = vmatprep.subr.bf16.mxu0 %v421_v52  ;;  %v373_v52 = vld [vmem:[%s3283_s1 + $0x2f8] sm:$0xff] }
  0x98   : > { %1677 = vmatpush1.bf16.msra.mxu0 %v420_v56 }
  0x99   : > { %1678 = vmatprep.subr.bf16.mxu0 %v423_v19 }
  0x9c   : > { %1679 = vmatpush1.bf16.msra.mxu0 %v422_v27  ;;  %v376_v27 = vld [vmem:[%s3283_s1 + $0x310] sm:$0xff] }
  0xe6   : > { %v595_v33 = vpop.f32.mrb[0].mxu0 }
  0xe7   : > { %v596_v37 = vadd.f32 %v595_v33, %v2550_v30  ;;  %v597_v38 = vpop.f32.mrb[1].mxu0  ;;  %v755_v60 = vpop.f32.mrb[0].mxu1 }
  0xe8   : > { %v598_v41 = vadd.f32 %v597_v38, %v2554_v32  ;;  %v599_v42 = vpop.f32.mrb[2].mxu0  ;;  %v756_v63 = vadd.f32 %v755_v60, %v2550_v30  ;;  %v757_v0 = vpop.f32.mrb[1].mxu1 }
  0xe9   : > { %v600_v44 = vadd.f32 %v599_v42, %v2550_v30  ;;  %v601_v45 = vpop.f32.mrb[3].mxu0  ;;  %v914_v50 = vmax.f32 %v596_v37, 0.0  ;;  %v758_v3 = vadd.f32 %v757_v0, %v2554_v32  ;;  %v759_v5 = vpop.f32.mrb[2].mxu1 }
  0xea   : > { %v602_v46 = vadd.f32 %v601_v45, %v2554_v32  ;;  %v915_v54 = vmax.f32 %v598_v41, 0.0  ;;  %v978_v8 = vmax.f32 %v756_v63, 0.0  ;;  %v760_v9 = vadd.f32 %v759_v5, %v2550_v30  ;;  %v761_v10 = vpop.f32.mrb[3].mxu1 }
  0xeb   : > { %v916_v51 = vmax.f32 %v600_v44, 0.0  ;;  %v979_v12 = vmax.f32 %v758_v3, 0.0  ;;  %v762_v4 = vadd.f32 %v761_v10, %v2554_v32 }
  0xec   : > { %v917_v55 = vmax.f32 %v602_v46, 0.0  ;;  %v980_v18 = vmax.f32 %v760_v9, 0.0 }
  0xed   : > { %v1042_v57 = vpack.c.bf16 %v916_v51, %v914_v50  ;;  %v981_v26 = vmax.f32 %v762_v4, 0.0 }
  0xee   : > { %v1043_v58 = vpack.c.bf16 %v917_v55, %v915_v54  ;;  %v605_v59 = vpop.f32.mrb[4].mxu0  ;;  %v2604_v29 = vpack.c.bf16 %v980_v18, %v978_v8  ;;  %v372_v54 = vld [vmem:[%s3283_s1 + $0x2f0] sm:$0xff] }
  0xef   : > { %v606_v61 = vadd.f32 %v605_v59, %v2550_v30  ;;  %v607_v62 = vpop.f32.mrb[5].mxu0  ;;  %v2606_v34 = vpack.c.bf16 %v981_v26, %v979_v12  ;;  %v765_v35 = vpop.f32.mrb[4].mxu1  ;;  %v374_v59 = vld [vmem:[%s3283_s1 + $0x300] sm:$0xff]  ;;  %v379_v26 = vld [vmem:[%s3283_s1 + $0x328] sm:$0xff] }
  0xf0   : > { %v608_v1 = vadd.f32 %v607_v62, %v2554_v32  ;;  %v609_v2 = vpop.f32.mrb[6].mxu0  ;;  %1149 = vmatprep.mubr.bf16.mxu1 %v1043_v58  ;;  %v766_v38 = vadd.f32 %v765_v35, %v2550_v30  ;;  %v767_v39 = vpop.f32.mrb[5].mxu1  ;;  %v425_v58 = vpack.c.bf16 %v375_v53, %v373_v52  ;;  %v424_v63 = vpack.c.bf16 %v374_v59, %v372_v54 }
  0xf1   : > { %v610_v6 = vadd.f32 %v609_v2, %v2550_v30  ;;  %v611_v7 = vpop.f32.mrb[7].mxu0  ;;  %1150 = vmatmul.mubr.bf16.vlgmr.msra.gmra.mrb[64].mxu1 %v1042_v57  ;;  %v918_v16 = vmax.f32 %v606_v61, 0.0  ;;  %v768_v42 = vadd.f32 %v767_v39, %v2554_v32  ;;  %v769_v43 = vpop.f32.mrb[6].mxu1 }
  0xf2   : > { %v612_v11 = vadd.f32 %v611_v7, %v2554_v32  ;;  %v919_v23 = vmax.f32 %v608_v1, 0.0  ;;  %v982_v46 = vmax.f32 %v766_v38, 0.0  ;;  %v770_v47 = vadd.f32 %v769_v43, %v2550_v30  ;;  %v771_v48 = vpop.f32.mrb[7].mxu1  ;;  %1680 = vmatprep.subr.bf16.mxu0 %v425_v58 }
  0xf3   : > { %v920_v17 = vmax.f32 %v610_v6, 0.0  ;;  %v983_v50 = vmax.f32 %v768_v42, 0.0  ;;  %v772_v51 = vadd.f32 %v771_v48, %v2554_v32  ;;  %1681 = vmatpush1.bf16.msra.mxu0 %v424_v63  ;;  %v381_v63 = vld [vmem:[%s3283_s1 + $0x338] sm:$0xff] }
  0xf4   : > { %v921_v25 = vmax.f32 %v612_v11, 0.0  ;;  %v984_v57 = vmax.f32 %v770_v47, 0.0 }
  0xf5   : > { %v1044_v28 = vpack.c.bf16 %v920_v17, %v918_v16  ;;  %v985_v62 = vmax.f32 %v772_v51, 0.0 }
  0xf6   : > { %v1045_v31 = vpack.c.bf16 %v921_v25, %v919_v23  ;;  %v615_v33 = vpop.f32.mrb[8].mxu0  ;;  %v2628_v1 = vpack.c.bf16 %v984_v57, %v982_v46  ;;  %v377_v25 = vld [vmem:[%s3283_s1 + $0x318] sm:$0xff] }
  0xf7   : > { %v616_v36 = vadd.f32 %v615_v33, %v2550_v30  ;;  %v617_v37 = vpop.f32.mrb[9].mxu0  ;;  %v2630_v5 = vpack.c.bf16 %v985_v62, %v983_v50  ;;  %v775_v6 = vpop.f32.mrb[8].mxu1  ;;  %v427_v35 = vpack.c.bf16 %v379_v26, %v377_v25 }
  0xf8   : > { %v618_v40 = vadd.f32 %v617_v37, %v2554_v32  ;;  %v619_v41 = vpop.f32.mrb[10].mxu0  ;;  %1159 = vmatprep.mubr.bf16.mxu1 %v1045_v31  ;;  %v776_v9 = vadd.f32 %v775_v6, %v2550_v30  ;;  %v777_v10 = vpop.f32.mrb[9].mxu1 }
  0xf9   : > { %v620_v44 = vadd.f32 %v619_v41, %v2550_v30  ;;  %v621_v45 = vpop.f32.mrb[11].mxu0  ;;  %1160 = vmatmul.mubr.bf16.gmra.mrb[68].mxu1 %v1044_v28  ;;  %v922_v55 = vmax.f32 %v616_v36, 0.0  ;;  %v778_v4 = vadd.f32 %v777_v10, %v2554_v32  ;;  %v779_v13 = vpop.f32.mrb[10].mxu1  ;;  %v378_v36 = vld [vmem:[%s3283_s1 + $0x320] sm:$0xff]  ;;  %1682 = vmatprep.subr.bf16.mxu0 %v427_v35 }
  0xfa   : > { %v622_v49 = vadd.f32 %v621_v45, %v2554_v32  ;;  %v923_v60 = vmax.f32 %v618_v40, 0.0  ;;  %v986_v16 = vmax.f32 %v776_v9, 0.0  ;;  %v780_v17 = vadd.f32 %v779_v13, %v2550_v30  ;;  %v781_v18 = vpop.f32.mrb[11].mxu1  ;;  %v382_v9 = vld [vmem:[%s3283_s1 + $0x340] sm:$0xff] }
  0xfb   : > { %v924_v56 = vmax.f32 %v620_v44, 0.0  ;;  %v987_v21 = vmax.f32 %v778_v4, 0.0  ;;  %v782_v23 = vadd.f32 %v781_v18, %v2554_v32  ;;  %v426_v40 = vpack.c.bf16 %v378_v36, %v376_v27 }
  0xfc   : > { %v925_v61 = vmax.f32 %v622_v49, 0.0  ;;  %v988_v33 = vmax.f32 %v780_v17, 0.0 }
  0xfd   : > { %v1046_v0 = vpack.c.bf16 %v924_v56, %v922_v55  ;;  %v989_v39 = vmax.f32 %v782_v23, 0.0  ;;  %1683 = vmatpush1.bf16.msra.mxu0 %v426_v40 }
  0xfe   : > { %v1047_v2 = vpack.c.bf16 %v925_v61, %v923_v60  ;;  %v625_v3 = vpop.f32.mrb[12].mxu0  ;;  %v2652_v42 = vpack.c.bf16 %v988_v33, %v986_v16 }
  0xff   : > { %v626_v7 = vadd.f32 %v625_v3, %v2550_v30  ;;  %v627_v8 = vpop.f32.mrb[13].mxu0  ;;  %v2654_v45 = vpack.c.bf16 %v989_v39, %v987_v21  ;;  %v785_v46 = vpop.f32.mrb[12].mxu1 }
 0x100   : > { %v628_v11 = vadd.f32 %v627_v8, %v2554_v32  ;;  %v629_v12 = vpop.f32.mrb[14].mxu0  ;;  %1169 = vmatprep.mubr.bf16.mxu1 %v1047_v2  ;;  %v786_v49 = vadd.f32 %v785_v46, %v2550_v30  ;;  %v787_v50 = vpop.f32.mrb[13].mxu1  ;;  %v380_v2 = vld [vmem:[%s3283_s1 + $0x330] sm:$0xff] }
 0x101   : > { %v630_v14 = vadd.f32 %v629_v12, %v2550_v30  ;;  %v631_v15 = vpop.f32.mrb[15].mxu0  ;;  %1170 = vmatmul.mubr.bf16.gmra.mrb[72].mxu1 %v1046_v0  ;;  %v926_v28 = vmax.f32 %v626_v7, 0.0  ;;  %v788_v53 = vadd.f32 %v787_v50, %v2554_v32  ;;  %v789_v54 = vpop.f32.mrb[14].mxu1  ;;  %v383_v0 = vld [vmem:[%s3283_s1 + $0x348] sm:$0xff]  ;;  %v428_v4 = vpack.c.bf16 %v382_v9, %v380_v2  ;;  %v384_v46 = vld [vmem:[%s3283_s1 + $0x350] sm:$0xff] }
 0x102   : > { %v632_v19 = vadd.f32 %v631_v15, %v2554_v32  ;;  %v927_v37 = vmax.f32 %v628_v11, 0.0  ;;  %v990_v57 = vmax.f32 %v786_v49, 0.0  ;;  %v790_v58 = vadd.f32 %v789_v54, %v2550_v30  ;;  %v791_v59 = vpop.f32.mrb[15].mxu1 }
 0x103   : > { %v928_v31 = vmax.f32 %v630_v14, 0.0  ;;  %v991_v61 = vmax.f32 %v788_v53, 0.0  ;;  %v792_v62 = vadd.f32 %v791_v59, %v2554_v32  ;;  %v429_v8 = vpack.c.bf16 %v383_v0, %v381_v63 }
 0x104   : > { %v929_v38 = vmax.f32 %v632_v19, 0.0  ;;  %v992_v7 = vmax.f32 %v790_v58, 0.0 }
 0x105   : > { %v1048_v41 = vpack.c.bf16 %v928_v31, %v926_v28  ;;  %v993_v12 = vmax.f32 %v792_v62, 0.0  ;;  %1684 = vmatprep.subr.bf16.mxu0 %v429_v8 }
 0x106   : > { %v1049_v43 = vpack.c.bf16 %v929_v38, %v927_v37  ;;  %v635_v44 = vpop.f32.mrb[16].mxu0  ;;  %v2676_v14 = vpack.c.bf16 %v992_v7, %v990_v57  ;;  %1685 = vmatpush1.bf16.msra.mxu0 %v428_v4 }
 0x107   : > { %v636_v47 = vadd.f32 %v635_v44, %v2550_v30  ;;  %v637_v48 = vpop.f32.mrb[17].mxu0  ;;  %v2678_v17 = vpack.c.bf16 %v993_v12, %v991_v61  ;;  %v795_v18 = vpop.f32.mrb[16].mxu1  ;;  %v387_v44 = vld [vmem:[%s3283_s1 + $0x368] sm:$0xff] }
 0x108   : > { %v638_v51 = vadd.f32 %v637_v48, %v2554_v32  ;;  %v639_v52 = vpop.f32.mrb[18].mxu0  ;;  %1179 = vmatprep.mubr.bf16.mxu1 %v1049_v43  ;;  %v796_v23 = vadd.f32 %v795_v18, %v2550_v30  ;;  %v797_v25 = vpop.f32.mrb[17].mxu1  ;;  %v385_v43 = vld [vmem:[%s3283_s1 + $0x358] sm:$0xff] }
 0x109   : > { %v640_v55 = vadd.f32 %v639_v52, %v2550_v30  ;;  %v641_v56 = vpop.f32.mrb[19].mxu0  ;;  %1180 = vmatmul.mubr.bf16.gmra.mrb[76].mxu1 %v1048_v41  ;;  %v930_v3 = vmax.f32 %v636_v47, 0.0  ;;  %v798_v28 = vadd.f32 %v797_v25, %v2554_v32  ;;  %v799_v31 = vpop.f32.mrb[18].mxu1  ;;  %v431_v50 = vpack.c.bf16 %v387_v44, %v385_v43  ;;  %v389_v18 = vld [vmem:[%s3283_s1 + $0x378] sm:$0xff] }
 0x10a   : > { %v642_v60 = vadd.f32 %v641_v56, %v2554_v32  ;;  %v931_v10 = vmax.f32 %v638_v51, 0.0  ;;  %v994_v36 = vmax.f32 %v796_v23, 0.0  ;;  %v800_v37 = vadd.f32 %v799_v31, %v2550_v30  ;;  %v801_v38 = vpop.f32.mrb[19].mxu1  ;;  %v386_v51 = vld [vmem:[%s3283_s1 + $0x360] sm:$0xff] }
 0x10b   : > { %v932_v6 = vmax.f32 %v640_v55, 0.0  ;;  %v995_v40 = vmax.f32 %v798_v28, 0.0  ;;  %v802_v41 = vadd.f32 %v801_v38, %v2554_v32  ;;  %v430_v55 = vpack.c.bf16 %v386_v51, %v384_v46  ;;  %1686 = vmatprep.subr.bf16.mxu0 %v431_v50  ;;  %v390_v28 = vld [vmem:[%s3283_s1 + $0x380] sm:$0xff] }
 0x10c   : > { %v933_v11 = vmax.f32 %v642_v60, 0.0  ;;  %v996_v49 = vmax.f32 %v800_v37, 0.0 }
 0x10d   : > { %v1050_v13 = vpack.c.bf16 %v932_v6, %v930_v3  ;;  %v997_v54 = vmax.f32 %v802_v41, 0.0  ;;  %1687 = vmatpush1.bf16.msra.mxu0 %v430_v55 }
 0x10e   : > { %v1051_v15 = vpack.c.bf16 %v933_v11, %v931_v10  ;;  %v645_v16 = vpop.f32.mrb[20].mxu0  ;;  %v2700_v57 = vpack.c.bf16 %v996_v49, %v994_v36 }
 0x10f   : > { %v646_v19 = vadd.f32 %v645_v16, %v2550_v30  ;;  %v647_v21 = vpop.f32.mrb[21].mxu0  ;;  %v2702_v60 = vpack.c.bf16 %v997_v54, %v995_v40  ;;  %v805_v61 = vpop.f32.mrb[20].mxu1 }
 0x110   : > { %v648_v26 = vadd.f32 %v647_v21, %v2554_v32  ;;  %v649_v27 = vpop.f32.mrb[22].mxu0  ;;  %1189 = vmatprep.mubr.bf16.mxu1 %v1051_v15  ;;  %v806_v0 = vadd.f32 %v805_v61, %v2550_v30  ;;  %v807_v2 = vpop.f32.mrb[21].mxu1  ;;  %v388_v21 = vld [vmem:[%s3283_s1 + $0x370] sm:$0xff] }
 0x111   : > { %v650_v33 = vadd.f32 %v649_v27, %v2550_v30  ;;  %v651_v35 = vpop.f32.mrb[23].mxu0  ;;  %1190 = vmatmul.mubr.bf16.gmra.mrb[80].mxu1 %v1050_v13  ;;  %v934_v47 = vmax.f32 %v646_v19, 0.0  ;;  %v808_v7 = vadd.f32 %v807_v2, %v2554_v32  ;;  %v809_v8 = vpop.f32.mrb[22].mxu1  ;;  %v391_v19 = vld [vmem:[%s3283_s1 + $0x388] sm:$0xff]  ;;  %v432_v36 = vpack.c.bf16 %v390_v28, %v388_v21  ;;  %v392_v2 = vld [vmem:[%s3283_s1 + $0x390] sm:$0xff] }
 0x112   : > { %v652_v39 = vadd.f32 %v651_v35, %v2554_v32  ;;  %v935_v52 = vmax.f32 %v648_v26, 0.0  ;;  %v998_v11 = vmax.f32 %v806_v0, 0.0  ;;  %v810_v12 = vadd.f32 %v809_v8, %v2550_v30  ;;  %v811_v4 = vpop.f32.mrb[23].mxu1  ;;  %v395_v0 = vld [vmem:[%s3283_s1 + $0x3a8] sm:$0xff] }
 0x113   : > { %v936_v48 = vmax.f32 %v650_v33, 0.0  ;;  %v999_v15 = vmax.f32 %v808_v7, 0.0  ;;  %v812_v16 = vadd.f32 %v811_v4, %v2554_v32  ;;  %v433_v27 = vpack.c.bf16 %v391_v19, %v389_v18 }
 0x114   : > { %v937_v53 = vmax.f32 %v652_v39, 0.0  ;;  %v1000_v26 = vmax.f32 %v810_v12, 0.0 }
 0x115   : > { %v1052_v56 = vpack.c.bf16 %v936_v48, %v934_v47  ;;  %v1001_v35 = vmax.f32 %v812_v16, 0.0  ;;  %1688 = vmatprep.subr.bf16.mxu0 %v433_v27 }
 0x116   : > { %v1053_v58 = vpack.c.bf16 %v937_v53, %v935_v52  ;;  %v655_v59 = vpop.f32.mrb[24].mxu0  ;;  %v2724_v38 = vpack.c.bf16 %v1000_v26, %v998_v11  ;;  %1689 = vmatpush1.bf16.msra.mxu0 %v432_v36 }
 0x117   : > { %v656_v62 = vadd.f32 %v655_v59, %v2550_v30  ;;  %v657_v63 = vpop.f32.mrb[25].mxu0  ;;  %v2726_v41 = vpack.c.bf16 %v1001_v35, %v999_v15  ;;  %v815_v43 = vpop.f32.mrb[24].mxu1 }
 0x118   : > { %v658_v3 = vadd.f32 %v657_v63, %v2554_v32  ;;  %v659_v6 = vpop.f32.mrb[26].mxu0  ;;  %1199 = vmatprep.mubr.bf16.mxu1 %v1053_v58  ;;  %v816_v47 = vadd.f32 %v815_v43, %v2550_v30  ;;  %v817_v48 = vpop.f32.mrb[25].mxu1  ;;  %v393_v63 = vld [vmem:[%s3283_s1 + $0x398] sm:$0xff] }
 0x119   : > { %v660_v9 = vadd.f32 %v659_v6, %v2550_v30  ;;  %v661_v10 = vpop.f32.mrb[27].mxu0  ;;  %1200 = vmatmul.mubr.bf16.gmra.mrb[84].mxu1 %v1052_v56  ;;  %v938_v23 = vmax.f32 %v656_v62, 0.0  ;;  %v818_v51 = vadd.f32 %v817_v48, %v2554_v32  ;;  %v819_v52 = vpop.f32.mrb[26].mxu1  ;;  %v435_v8 = vpack.c.bf16 %v395_v0, %v393_v63  ;;  %v397_v48 = vld [vmem:[%s3283_s1 + $0x3b8] sm:$0xff] }
 0x11a   : > { %v662_v13 = vadd.f32 %v661_v10, %v2554_v32  ;;  %v939_v31 = vmax.f32 %v658_v3, 0.0  ;;  %v1002_v55 = vmax.f32 %v816_v47, 0.0  ;;  %v820_v56 = vadd.f32 %v819_v52, %v2550_v30  ;;  %v821_v58 = vpop.f32.mrb[27].mxu1 }
 0x11b   : > { %v940_v25 = vmax.f32 %v660_v9, 0.0  ;;  %v1003_v61 = vmax.f32 %v818_v51, 0.0  ;;  %v822_v62 = vadd.f32 %v821_v58, %v2554_v32  ;;  %v394_v9 = vld [vmem:[%s3283_s1 + $0x3a0] sm:$0xff]  ;;  %1690 = vmatprep.subr.bf16.mxu0 %v435_v8 }
 0x11c   : > { %v941_v33 = vmax.f32 %v662_v13, 0.0  ;;  %v1004_v7 = vmax.f32 %v820_v56, 0.0  ;;  %v434_v4 = vpack.c.bf16 %v394_v9, %v392_v2 }
 0x11d   : > { %v1054_v37 = vpack.c.bf16 %v940_v25, %v938_v23  ;;  %v1005_v12 = vmax.f32 %v822_v62, 0.0 }
 0x11e   : > { %v1055_v39 = vpack.c.bf16 %v941_v33, %v939_v31  ;;  %v665_v40 = vpop.f32.mrb[28].mxu0  ;;  %v2748_v15 = vpack.c.bf16 %v1004_v7, %v1002_v55  ;;  %1691 = vmatpush1.bf16.msra.mxu0 %v434_v4  ;;  %v398_v55 = vld [vmem:[%s3283_s1 + $0x3c0] sm:$0xff] }
 0x11f   : > { %v666_v44 = vadd.f32 %v665_v40, %v2550_v30  ;;  %v667_v46 = vpop.f32.mrb[29].mxu0  ;;  %v2750_v19 = vpack.c.bf16 %v1005_v12, %v1003_v61  ;;  %v825_v21 = vpop.f32.mrb[28].mxu1 }
 0x120   : > { %v668_v49 = vadd.f32 %v667_v46, %v2554_v32  ;;  %v669_v50 = vpop.f32.mrb[30].mxu0  ;;  %1209 = vmatprep.mubr.bf16.mxu1 %v1055_v39  ;;  %v826_v26 = vadd.f32 %v825_v21, %v2550_v30  ;;  %v827_v27 = vpop.f32.mrb[29].mxu1 }
 0x121   : > { %v670_v53 = vadd.f32 %v669_v50, %v2550_v30  ;;  %v671_v54 = vpop.f32.mrb[31].mxu0  ;;  %1210 = vmatmul.mubr.bf16.gmra.mrb[88].mxu1 %v1054_v37  ;;  %v942_v3 = vmax.f32 %v666_v44, 0.0  ;;  %v828_v33 = vadd.f32 %v827_v27, %v2554_v32  ;;  %v829_v35 = vpop.f32.mrb[30].mxu1  ;;  %v396_v50 = vld [vmem:[%s3283_s1 + $0x3b0] sm:$0xff] }
 0x122   : > { %v672_v59 = vadd.f32 %v671_v54, %v2554_v32  ;;  %v943_v10 = vmax.f32 %v668_v49, 0.0  ;;  %v1006_v39 = vmax.f32 %v826_v26, 0.0  ;;  %v830_v40 = vadd.f32 %v829_v35, %v2550_v30  ;;  %v831_v43 = vpop.f32.mrb[31].mxu1  ;;  %v399_v49 = vld [vmem:[%s3283_s1 + $0x3c8] sm:$0xff]  ;;  %v400_v35 = vld [vmem:[%s3283_s1 + $0x3d0] sm:$0xff] }
 0x123   : > { %v944_v6 = vmax.f32 %v670_v53, 0.0  ;;  %v1007_v46 = vmax.f32 %v828_v33, 0.0  ;;  %v832_v47 = vadd.f32 %v831_v43, %v2554_v32  ;;  %v437_v54 = vpack.c.bf16 %v399_v49, %v397_v48  ;;  %v403_v33 = vld [vmem:[%s3283_s1 + $0x3e8] sm:$0xff]  ;;  %v402_v43 = vld [vmem:[%s3283_s1 + $0x3e0] sm:$0xff] }
 0x124   : > { %v945_v11 = vmax.f32 %v672_v59, 0.0  ;;  %v1008_v53 = vmax.f32 %v830_v40, 0.0  ;;  %v436_v61 = vpack.c.bf16 %v398_v55, %v396_v50  ;;  %v438_v48 = vpack.c.bf16 %v402_v43, %v400_v35 }
 0x125   : > { %v1056_v13 = vpack.c.bf16 %v944_v6, %v942_v3  ;;  %v1009_v59 = vmax.f32 %v832_v47, 0.0  ;;  %1692 = vmatprep.subr.bf16.mxu0 %v437_v54 }
 0x126   : > { %v1057_v16 = vpack.c.bf16 %v945_v11, %v943_v10  ;;  %v675_v18 = vpop.f32.mrb[32].mxu0  ;;  %v2772_v63 = vpack.c.bf16 %v1008_v53, %v1006_v39  ;;  %1693 = vmatpush1.bf16.msra.mxu0 %v436_v61 }
 0x127   : > { %v676_v23 = vadd.f32 %v675_v18, %v2550_v30  ;;  %v677_v25 = vpop.f32.mrb[33].mxu0  ;;  %v2774_v3 = vpack.c.bf16 %v1009_v59, %v1007_v46  ;;  %v835_v6 = vpop.f32.mrb[32].mxu1 }
 0x128   : > { %v678_v28 = vadd.f32 %v677_v25, %v2554_v32  ;;  %v679_v31 = vpop.f32.mrb[34].mxu0  ;;  %1219 = vmatprep.mubr.bf16.mxu1 %v1057_v16  ;;  %v836_v9 = vadd.f32 %v835_v6, %v2550_v30  ;;  %v837_v10 = vpop.f32.mrb[33].mxu1 }
 0x129   : > { %v680_v36 = vadd.f32 %v679_v31, %v2550_v30  ;;  %v681_v37 = vpop.f32.mrb[35].mxu0  ;;  %1220 = vmatmul.mubr.bf16.gmra.mrb[92].mxu1 %v1056_v13  ;;  %v946_v51 = vmax.f32 %v676_v23, 0.0  ;;  %v838_v4 = vadd.f32 %v837_v10, %v2554_v32  ;;  %v839_v13 = vpop.f32.mrb[34].mxu1  ;;  %v401_v31 = vld [vmem:[%s3283_s1 + $0x3d8] sm:$0xff] }
 0x12a   : > { %v682_v44 = vadd.f32 %v681_v37, %v2554_v32  ;;  %v947_v56 = vmax.f32 %v678_v28, 0.0  ;;  %v1010_v21 = vmax.f32 %v836_v9, 0.0  ;;  %v840_v23 = vadd.f32 %v839_v13, %v2550_v30  ;;  %v841_v25 = vpop.f32.mrb[35].mxu1  ;;  %v405_v13 = vld [vmem:[%s3283_s1 + $0x3f8] sm:$0xff] }
 0x12b   : > { %v948_v52 = vmax.f32 %v680_v36, 0.0  ;;  %v1011_v27 = vmax.f32 %v838_v4, 0.0  ;;  %v842_v28 = vadd.f32 %v841_v25, %v2554_v32  ;;  %v439_v40 = vpack.c.bf16 %v403_v33, %v401_v31 }
 0x12c   : > { %v949_v58 = vmax.f32 %v682_v44, 0.0  ;;  %v1012_v39 = vmax.f32 %v840_v23, 0.0 }
 0x12d   : > { %v1058_v62 = vpack.c.bf16 %v948_v52, %v946_v51  ;;  %v1013_v47 = vmax.f32 %v842_v28, 0.0  ;;  %1694 = vmatprep.subr.bf16.mxu0 %v439_v40 }
 0x12e   : > { %v1059_v0 = vpack.c.bf16 %v949_v58, %v947_v56  ;;  %v685_v2 = vpop.f32.mrb[36].mxu0  ;;  %v2796_v50 = vpack.c.bf16 %v1012_v39, %v1010_v21  ;;  %1695 = vmatpush1.bf16.msra.mxu0 %v438_v48 }
 0x12f   : > { %v686_v7 = vadd.f32 %v685_v2, %v2550_v30  ;;  %v687_v8 = vpop.f32.mrb[37].mxu0  ;;  %v2798_v53 = vpack.c.bf16 %v1013_v47, %v1011_v27  ;;  %v845_v54 = vpop.f32.mrb[36].mxu1  ;;  %v406_v27 = vld [vmem:[%s3283_s1 + $0x400] sm:$0xff] }
 0x130   : > { %v688_v11 = vadd.f32 %v687_v8, %v2554_v32  ;;  %v689_v12 = vpop.f32.mrb[38].mxu0  ;;  %1229 = vmatprep.mubr.bf16.mxu1 %v1059_v0  ;;  %v846_v58 = vadd.f32 %v845_v54, %v2550_v30  ;;  %v847_v59 = vpop.f32.mrb[37].mxu1 }
 0x131   : > { %v690_v16 = vadd.f32 %v689_v12, %v2550_v30  ;;  %v691_v18 = vpop.f32.mrb[39].mxu0  ;;  %1230 = vmatmul.mubr.bf16.gmra.mrb[96].mxu1 %v1058_v62  ;;  %v950_v36 = vmax.f32 %v686_v7, 0.0  ;;  %v848_v0 = vadd.f32 %v847_v59, %v2554_v32  ;;  %v849_v2 = vpop.f32.mrb[38].mxu1 }
 0x132   : > { %v692_v26 = vadd.f32 %v691_v18, %v2554_v32  ;;  %v951_v44 = vmax.f32 %v688_v11, 0.0  ;;  %v1014_v8 = vmax.f32 %v846_v58, 0.0  ;;  %v850_v9 = vadd.f32 %v849_v2, %v2550_v30  ;;  %v851_v10 = vpop.f32.mrb[39].mxu1  ;;  %v404_v18 = vld [vmem:[%s3283_s1 + $0x3f0] sm:$0xff] }
 0x133   : > { %v952_v37 = vmax.f32 %v690_v16, 0.0  ;;  %v1015_v12 = vmax.f32 %v848_v0, 0.0  ;;  %v852_v4 = vadd.f32 %v851_v10, %v2554_v32  ;;  %v407_v16 = vld [vmem:[%s3283_s1 + $0x408] sm:$0xff]  ;;  %v440_v35 = vpack.c.bf16 %v406_v27, %v404_v18 }
 0x134   : > { %v953_v46 = vmax.f32 %v692_v26, 0.0  ;;  %v1016_v25 = vmax.f32 %v850_v9, 0.0  ;;  %v441_v26 = vpack.c.bf16 %v407_v16, %v405_v13 }
 0x135   : > { %v1060_v49 = vpack.c.bf16 %v952_v37, %v950_v36  ;;  %v1017_v33 = vmax.f32 %v852_v4, 0.0 }
 0x136   : > { %v1061_v51 = vpack.c.bf16 %v953_v46, %v951_v44  ;;  %v695_v52 = vpop.f32.mrb[40].mxu0  ;;  %v2820_v37 = vpack.c.bf16 %v1016_v25, %v1014_v8  ;;  %1696 = vmatprep.subr.bf16.mxu0 %v441_v26 }
 0x137   : > { %v696_v55 = vadd.f32 %v695_v52, %v2550_v30  ;;  %v697_v56 = vpop.f32.mrb[41].mxu0  ;;  %v2822_v43 = vpack.c.bf16 %v1017_v33, %v1015_v12  ;;  %v855_v44 = vpop.f32.mrb[40].mxu1  ;;  %1697 = vmatpush1.bf16.msra.mxu0 %v440_v35 }
 0x138   : > { %v698_v61 = vadd.f32 %v697_v56, %v2554_v32  ;;  %v699_v62 = vpop.f32.mrb[42].mxu0  ;;  %1239 = vmatprep.mubr.bf16.mxu1 %v1061_v51  ;;  %v856_v48 = vadd.f32 %v855_v44, %v2550_v30 }
 0x139   : > { %v700_v6 = vadd.f32 %v699_v62, %v2550_v30  ;;  %v701_v7 = vpop.f32.mrb[43].mxu0  ;;  %1240 = vmatmul.mubr.bf16.gmra.mrb[100].mxu1 %v1060_v49  ;;  %v954_v21 = vmax.f32 %v696_v55, 0.0  ;;  %v857_v49 = vpop.f32.mrb[41].mxu1 }
 0x13a   : > { %v702_v11 = vadd.f32 %v701_v7, %v2554_v32  ;;  %v955_v28 = vmax.f32 %v698_v61, 0.0  ;;  %v858_v54 = vadd.f32 %v857_v49, %v2554_v32  ;;  %v859_v55 = vpop.f32.mrb[42].mxu1  ;;  %v1018_v59 = vmax.f32 %v856_v48, 0.0 }
 0x13b   : > { %v956_v23 = vmax.f32 %v700_v6, 0.0  ;;  %v860_v61 = vadd.f32 %v859_v55, %v2550_v30  ;;  %v861_v62 = vpop.f32.mrb[43].mxu1 }
 0x13c   : > { %v957_v31 = vmax.f32 %v702_v11, 0.0  ;;  %v1019_v2 = vmax.f32 %v858_v54, 0.0  ;;  %v862_v6 = vadd.f32 %v861_v62, %v2554_v32 }
 0x13d   : > { %v1062_v36 = vpack.c.bf16 %v956_v23, %v954_v21  ;;  %v1020_v9 = vmax.f32 %v860_v61, 0.0 }
 0x13e   : > { %v1063_v39 = vpack.c.bf16 %v957_v31, %v955_v28  ;;  %v705_v40 = vpop.f32.mrb[44].mxu0  ;;  %v1021_v12 = vmax.f32 %v862_v6, 0.0 }
 0x13f   : > { %v706_v46 = vadd.f32 %v705_v40, %v2550_v30  ;;  %v707_v47 = vpop.f32.mrb[45].mxu0  ;;  %v2832_v13 = vpack.c.bf16 %v1020_v9, %v1018_v59  ;;  %v865_v23 = vpop.f32.mrb[44].mxu1  ;;  %v411_v40 = vld [vmem:[%s3283_s1 + $0x428] sm:$0xff] }
 0x140   : > { %v708_v51 = vadd.f32 %v707_v47, %v2554_v32  ;;  %v709_v52 = vpop.f32.mrb[46].mxu0  ;;  %1249 = vmatprep.mubr.bf16.mxu1 %v1063_v39  ;;  %v2834_v21 = vpack.c.bf16 %v1021_v12, %v1019_v2  ;;  %v866_v27 = vadd.f32 %v865_v23, %v2550_v30  ;;  %v867_v28 = vpop.f32.mrb[45].mxu1  ;;  %v409_v39 = vld [vmem:[%s3283_s1 + $0x418] sm:$0xff] }
 0x141   : > { %v710_v56 = vadd.f32 %v709_v52, %v2550_v30  ;;  %v711_v58 = vpop.f32.mrb[47].mxu0  ;;  %1250 = vmatmul.mubr.bf16.gmra.mrb[104].mxu1 %v1062_v36  ;;  %v958_v7 = vmax.f32 %v706_v46, 0.0  ;;  %v868_v35 = vadd.f32 %v867_v28, %v2554_v32  ;;  %v869_v36 = vpop.f32.mrb[46].mxu1  ;;  %v410_v52 = vld [vmem:[%s3283_s1 + $0x420] sm:$0xff]  ;;  %v443_v62 = vpack.c.bf16 %v411_v40, %v409_v39 }
 0x142   : > { %v712_v0 = vadd.f32 %v711_v58, %v2554_v32  ;;  %v959_v10 = vmax.f32 %v708_v51, 0.0  ;;  %v1022_v47 = vmax.f32 %v866_v27, 0.0  ;;  %v870_v48 = vadd.f32 %v869_v36, %v2550_v30  ;;  %v871_v49 = vpop.f32.mrb[47].mxu1  ;;  %v408_v51 = vld [vmem:[%s3283_s1 + $0x410] sm:$0xff] }
 0x143   : > { %v960_v8 = vmax.f32 %v710_v56, 0.0  ;;  %v1023_v56 = vmax.f32 %v868_v35, 0.0  ;;  %v872_v58 = vadd.f32 %v871_v49, %v2554_v32  ;;  %1698 = vmatprep.subr.bf16.mxu0 %v443_v62 }
 0x144   : > { %v961_v11 = vmax.f32 %v712_v0, 0.0  ;;  %v1024_v61 = vmax.f32 %v870_v48, 0.0  ;;  %v442_v0 = vpack.c.bf16 %v410_v52, %v408_v51 }
 0x145   : > { %v1064_v4 = vpack.c.bf16 %v960_v8, %v958_v7  ;;  %v1025_v7 = vmax.f32 %v872_v58, 0.0 }
 0x146   : > { %v1065_v16 = vpack.c.bf16 %v961_v11, %v959_v10  ;;  %v715_v18 = vpop.f32.mrb[48].mxu0  ;;  %v2856_v9 = vpack.c.bf16 %v1024_v61, %v1022_v47  ;;  %1699 = vmatpush1.bf16.msra.mxu0 %v442_v0 }
 0x147   : > { %v716_v25 = vadd.f32 %v715_v18, %v2550_v30  ;;  %v717_v26 = vpop.f32.mrb[49].mxu0  ;;  %v2858_v12 = vpack.c.bf16 %v1025_v7, %v1023_v56 }
 0x148   : > { %v718_v31 = vadd.f32 %v717_v26, %v2554_v32  ;;  %v719_v33 = vpop.f32.mrb[50].mxu0  ;;  %1259 = vmatprep.mubr.bf16.mxu1 %v1065_v16 }
 0x149   : > { %v720_v44 = vadd.f32 %v719_v33, %v2550_v30  ;;  %v721_v46 = vpop.f32.mrb[51].mxu0  ;;  %1260 = vmatmul.mubr.bf16.gmra.mrb[108].mxu1 %v1064_v4  ;;  %v962_v54 = vmax.f32 %v716_v25, 0.0  ;;  %v875_v4 = vpop.f32.mrb[48].mxu1 }
 0x14a   : > { %v722_v55 = vadd.f32 %v721_v46, %v2554_v32  ;;  %v963_v2 = vmax.f32 %v718_v31, 0.0  ;;  %v876_v23 = vadd.f32 %v875_v4, %v2550_v30  ;;  %v877_v25 = vpop.f32.mrb[49].mxu1 }
 0x14b   : > { %v964_v59 = vmax.f32 %v720_v44, 0.0  ;;  %v878_v28 = vadd.f32 %v877_v25, %v2554_v32  ;;  %v879_v31 = vpop.f32.mrb[50].mxu1 }
 0x14c   : > { %v965_v6 = vmax.f32 %v722_v55, 0.0  ;;  %v1026_v36 = vmax.f32 %v876_v23, 0.0  ;;  %v880_v39 = vadd.f32 %v879_v31, %v2550_v30  ;;  %v881_v40 = vpop.f32.mrb[51].mxu1 }
 0x14d   : > { %v1066_v8 = vpack.c.bf16 %v964_v59, %v962_v54  ;;  %v1027_v46 = vmax.f32 %v878_v28, 0.0  ;;  %v882_v47 = vadd.f32 %v881_v40, %v2554_v32 }
 0x14e   : > { %v1067_v10 = vpack.c.bf16 %v965_v6, %v963_v2  ;;  %v725_v11 = vpop.f32.mrb[52].mxu0  ;;  %v1028_v51 = vmax.f32 %v880_v39, 0.0 }
 0x14f   : > { %v726_v16 = vadd.f32 %v725_v11, %v2550_v30  ;;  %v727_v18 = vpop.f32.mrb[53].mxu0  ;;  %v1029_v55 = vmax.f32 %v882_v47, 0.0  ;;  %v885_v0 = vpop.f32.mrb[52].mxu1 }
 0x150   : > { %v728_v26 = vadd.f32 %v727_v18, %v2554_v32  ;;  %v729_v27 = vpop.f32.mrb[54].mxu0  ;;  %1269 = vmatprep.mubr.bf16.mxu1 %v1067_v10  ;;  %v2868_v58 = vpack.c.bf16 %v1028_v51, %v1026_v36  ;;  %v886_v7 = vadd.f32 %v885_v0, %v2550_v30 }
 0x151   : > { %v730_v33 = vadd.f32 %v729_v27, %v2550_v30  ;;  %v731_v35 = vpop.f32.mrb[55].mxu0  ;;  %1270 = vmatmul.mubr.bf16.gmra.mrb[112].mxu1 %v1066_v8  ;;  %v966_v48 = vmax.f32 %v726_v16, 0.0  ;;  %v2870_v62 = vpack.c.bf16 %v1029_v55, %v1027_v46  ;;  %v887_v8 = vpop.f32.mrb[53].mxu1 }
 0x152   : > { %v732_v44 = vadd.f32 %v731_v35, %v2554_v32  ;;  %v967_v52 = vmax.f32 %v728_v26, 0.0  ;;  %v888_v4 = vadd.f32 %v887_v8, %v2554_v32  ;;  %v889_v16 = vpop.f32.mrb[54].mxu1  ;;  %v1030_v25 = vmax.f32 %v886_v7, 0.0 }
 0x153   : > { %v968_v49 = vmax.f32 %v730_v33, 0.0  ;;  %v890_v26 = vadd.f32 %v889_v16, %v2550_v30  ;;  %v891_v27 = vpop.f32.mrb[55].mxu1 }
 0x154   : > { %v969_v54 = vmax.f32 %v732_v44, 0.0  ;;  %v1031_v31 = vmax.f32 %v888_v4, 0.0  ;;  %v892_v33 = vadd.f32 %v891_v27, %v2554_v32 }
 0x155   : > { %v1068_v56 = vpack.c.bf16 %v968_v49, %v966_v48  ;;  %v1032_v39 = vmax.f32 %v890_v26, 0.0 }
 0x156   : > { %v1069_v59 = vpack.c.bf16 %v969_v54, %v967_v52  ;;  %v735_v61 = vpop.f32.mrb[56].mxu0  ;;  %v1033_v46 = vmax.f32 %v892_v33, 0.0 }
 0x157   : > { %v736_v2 = vadd.f32 %v735_v61, %v2550_v30  ;;  %v737_v6 = vpop.f32.mrb[57].mxu0  ;;  %v2880_v48 = vpack.c.bf16 %v1032_v39, %v1030_v25  ;;  %v895_v54 = vpop.f32.mrb[56].mxu1 }
 0x158   : > { %v738_v10 = vadd.f32 %v737_v6, %v2554_v32  ;;  %v739_v11 = vpop.f32.mrb[58].mxu0  ;;  %1279 = vmatprep.mubr.bf16.mxu1 %v1069_v59  ;;  %v2882_v52 = vpack.c.bf16 %v1033_v46, %v1031_v31  ;;  %v896_v59 = vadd.f32 %v895_v54, %v2550_v30  ;;  %v897_v61 = vpop.f32.mrb[57].mxu1 }
 0x159   : > { %v740_v18 = vadd.f32 %v739_v11, %v2550_v30  ;;  %v741_v23 = vpop.f32.mrb[59].mxu0  ;;  %1280 = vmatmul.mubr.bf16.gmra.mrb[116].mxu1 %v1068_v56  ;;  %v970_v35 = vmax.f32 %v736_v2, 0.0  ;;  %v898_v6 = vadd.f32 %v897_v61, %v2554_v32  ;;  %v899_v7 = vpop.f32.mrb[58].mxu1 }
 0x15a   : > { %v742_v28 = vadd.f32 %v741_v23, %v2554_v32  ;;  %v971_v40 = vmax.f32 %v738_v10, 0.0  ;;  %v1034_v11 = vmax.f32 %v896_v59, 0.0  ;;  %v900_v4 = vadd.f32 %v899_v7, %v2550_v30  ;;  %v901_v16 = vpop.f32.mrb[59].mxu1 }
 0x15b   : > { %v972_v36 = vmax.f32 %v740_v18, 0.0  ;;  %v1035_v23 = vmax.f32 %v898_v6, 0.0  ;;  %v902_v25 = vadd.f32 %v901_v16, %v2554_v32 }
 0x15c   : > { %v973_v44 = vmax.f32 %v742_v28, 0.0  ;;  %v1036_v28 = vmax.f32 %v900_v4, 0.0 }
 0x15d   : > { %v1070_v47 = vpack.c.bf16 %v972_v36, %v970_v35  ;;  %v1037_v35 = vmax.f32 %v902_v25, 0.0 }
 0x15e   : > { %v1071_v49 = vpack.c.bf16 %v973_v44, %v971_v40  ;;  %v745_v51 = vpop.f32.mrb[60].mxu0  ;;  %v2892_v39 = vpack.c.bf16 %v1036_v28, %v1034_v11 }
 0x15f   : > { %v746_v55 = vadd.f32 %v745_v51, %v2550_v30  ;;  %v747_v56 = vpop.f32.mrb[61].mxu0  ;;  %v2894_v44 = vpack.c.bf16 %v1037_v35, %v1035_v23  ;;  %v905_v46 = vpop.f32.mrb[60].mxu1 }
 0x160   : > { %v748_v0 = vadd.f32 %v747_v56, %v2554_v32  ;;  %v749_v2 = vpop.f32.mrb[62].mxu0  ;;  %1289 = vmatprep.mubr.bf16.mxu1 %v1071_v49  ;;  %v907_v49 = vpop.f32.mrb[61].mxu1 }
 0x161   : > { %v750_v8 = vadd.f32 %v749_v2, %v2550_v30  ;;  %v751_v10 = vpop.f32.mrb[63].mxu0  ;;  %1290 = vmatmul.mubr.bf16.gmra.mrb[120].mxu1 %v1070_v47  ;;  %v974_v26 = vmax.f32 %v746_v55, 0.0  ;;  %v906_v47 = vadd.f32 %v905_v46, %v2550_v30  ;;  %v908_v51 = vadd.f32 %v907_v49, %v2554_v32  ;;  %v909_v54 = vpop.f32.mrb[62].mxu1 }
 0x162   : > { %v752_v18 = vadd.f32 %v751_v10, %v2554_v32  ;;  %v975_v31 = vmax.f32 %v748_v0, 0.0  ;;  %v910_v56 = vadd.f32 %v909_v54, %v2550_v30  ;;  %v911_v59 = vpop.f32.mrb[63].mxu1  ;;  %v2088_v30 = vld [vmem:[%s3283_s1 + $0x220] ss:$8 sm:$0x3] }
 0x163   : > { %v976_v27 = vmax.f32 %v750_v8, 0.0  ;;  %v1038_v55 = vmax.f32 %v906_v47, 0.0  ;;  %v1039_v61 = vmax.f32 %v908_v51, 0.0  ;;  %v912_v0 = vadd.f32 %v911_v59, %v2554_v32 }
 0x164   : > { %v977_v33 = vmax.f32 %v752_v18, 0.0  ;;  %v1040_v2 = vmax.f32 %v910_v56, 0.0  ;;  %v2930_v32 = vrot.slane %v2088_v30, %v2531_v22 }
 0x165   : > { %v1072_v36 = vpack.c.bf16 %v976_v27, %v974_v26  ;;  %v1041_v6 = vmax.f32 %v912_v0, 0.0 }
 0x166   : > { %v1073_v40 = vpack.c.bf16 %v977_v33, %v975_v31  ;;  %v2901_v7 = vpack.c.bf16 %v1040_v2, %v1038_v55 }
 0x167   : > { %v2903_v8 = vpack.c.bf16 %v1041_v6, %v1039_v61 }
 0x168   : > { %1299 = vmatprep.mubr.bf16.mxu1 %v1073_v40 }
 0x169   : > { %1300 = vmatmul.mubr.bf16.gmra.mrb[124].mxu1 %v1072_v36 }
 0x16a   : > { %1309 = vmatprep.mubr.bf16.mxu1 %v2606_v34 }
 0x171   : > { %1310 = vmatmul.mubr.bf16.gmra.mrb[128].mxu1 %v2604_v29  ;;  %v2935_v29 = vrot.slane %v2088_v30, %v453_v24 }
 0x172   : > { %1319 = vmatprep.mubr.bf16.mxu1 %v2630_v5 }
 0x179   : > { %1320 = vmatmul.mubr.bf16.gmra.mrb[132].mxu1 %v2628_v1 }
 0x17a   : > { %1329 = vmatprep.mubr.bf16.mxu1 %v2654_v45 }
 0x181   : > { %1330 = vmatmul.mubr.bf16.gmra.mrb[136].mxu1 %v2652_v42 }
 0x182   : > { %1339 = vmatprep.mubr.bf16.mxu1 %v2678_v17 }
 0x189   : > { %1340 = vmatmul.mubr.bf16.gmra.mrb[140].mxu1 %v2676_v14 }
 0x18a   : > { %1349 = vmatprep.mubr.bf16.mxu1 %v2702_v60 }
 0x191   : > { %1350 = vmatmul.mubr.bf16.gmra.mrb[144].mxu1 %v2700_v57 }
 0x192   : > { %1359 = vmatprep.mubr.bf16.mxu1 %v2726_v41 }
 0x199   : > { %1360 = vmatmul.mubr.bf16.gmra.mrb[148].mxu1 %v2724_v38 }
 0x19a   : > { %1369 = vmatprep.mubr.bf16.mxu1 %v2750_v19 }
 0x1a1   : > { %1370 = vmatmul.mubr.bf16.gmra.mrb[152].mxu1 %v2748_v15 }
 0x1a2   : > { %1379 = vmatprep.mubr.bf16.mxu1 %v2774_v3 }
 0x1a9   : > { %1380 = vmatmul.mubr.bf16.gmra.mrb[156].mxu1 %v2772_v63 }
 0x1aa   : > { %1389 = vmatprep.mubr.bf16.mxu1 %v2798_v53 }
 0x1b1   : > { %1390 = vmatmul.mubr.bf16.gmra.mrb[160].mxu1 %v2796_v50 }
 0x1b2   : > { %1399 = vmatprep.mubr.bf16.mxu1 %v2822_v43 }
 0x1b9   : > { %1400 = vmatmul.mubr.bf16.gmra.mrb[164].mxu1 %v2820_v37 }
 0x1ba   : > { %1409 = vmatprep.mubr.bf16.mxu1 %v2834_v21 }
 0x1c1   : > { %1410 = vmatmul.mubr.bf16.gmra.mrb[168].mxu1 %v2832_v13 }
 0x1c2   : > { %1419 = vmatprep.mubr.bf16.mxu1 %v2858_v12 }
 0x1c4   : > { %v1151_v34 = vpop.f32.mrb[64].mxu1 }
 0x1c5   : > { %v1152_v1 = vadd.f32 %v1151_v34, %v2930_v32  ;;  %v1153_v5 = vpop.f32.mrb[65].mxu1 }
 0x1c6   : > { %v1154_v42 = vadd.f32 %v1153_v5, %v2935_v29  ;;  %v1155_v45 = vpop.f32.mrb[66].mxu1 }
 0x1c7   : > { %v1156_v14 = vadd.f32 %v1155_v45, %v2930_v32  ;;  %v1157_v17 = vpop.f32.mrb[67].mxu1  ;;  %v1470_v60 = vmax.f32 %v1152_v1, 0.0 }
 0x1c8   : > { %v1158_v57 = vadd.f32 %v1157_v17, %v2935_v29  ;;  %v1471_v41 = vmax.f32 %v1154_v42, 0.0 }
 0x1c9   : > { %v1472_v38 = vmax.f32 %v1156_v14, 0.0  ;;  %1420 = vmatmul.mubr.bf16.gmra.mrb[172].mxu1 %v2856_v9 }
 0x1ca   : > { %v1473_v20 = vmax.f32 %v1158_v57, 0.0  ;;  %1429 = vmatprep.mubr.bf16.mxu1 %v2870_v62 }
 0x1cb   : > { %v1598_v24 = vpack.c.bf16 %v1472_v38, %v1470_v60 }
 0x1cc   : > { %v1599_v15 = vpack.c.bf16 %v1473_v20, %v1471_v41  ;;  %v1161_v19 = vpop.f32.mrb[68].mxu1 }
 0x1cd   : > { %v1162_v63 = vadd.f32 %v1161_v19, %v2930_v32  ;;  %v1163_v3 = vpop.f32.mrb[69].mxu1 }
 0x1ce   : > { %v1164_v50 = vadd.f32 %v1163_v3, %v2935_v29  ;;  %v1165_v53 = vpop.f32.mrb[70].mxu1  ;;  %1700 = vmatprep.mubr.bf16.mxu0 %v1599_v15 }
 0x1cf   : > { %v1166_v37 = vadd.f32 %v1165_v53, %v2930_v32  ;;  %v1167_v43 = vpop.f32.mrb[71].mxu1  ;;  %1701 = vmatmul.mubr.bf16.vlgmr.msra.gmra.mrb[64].mxu0 %v1598_v24  ;;  %v1474_v21 = vmax.f32 %v1162_v63, 0.0 }
 0x1d0   : > { %v1168_v13 = vadd.f32 %v1167_v43, %v2935_v29  ;;  %v1475_v12 = vmax.f32 %v1164_v50, 0.0 }
 0x1d1   : > { %v1476_v9 = vmax.f32 %v1166_v37, 0.0  ;;  %1430 = vmatmul.mubr.bf16.gmra.mrb[176].mxu1 %v2868_v58 }
 0x1d2   : > { %v1477_v62 = vmax.f32 %v1168_v13, 0.0  ;;  %1439 = vmatprep.mubr.bf16.mxu1 %v2882_v52 }
 0x1d3   : > { %v1600_v10 = vpack.c.bf16 %v1476_v9, %v1474_v21 }
 0x1d4   : > { %v1601_v11 = vpack.c.bf16 %v1477_v62, %v1475_v12  ;;  %v1171_v4 = vpop.f32.mrb[72].mxu1 }
 0x1d5   : > { %v1172_v16 = vadd.f32 %v1171_v4, %v2930_v32  ;;  %v1173_v18 = vpop.f32.mrb[73].mxu1 }
 0x1d6   : > { %v1174_v23 = vadd.f32 %v1173_v18, %v2935_v29  ;;  %v1175_v25 = vpop.f32.mrb[74].mxu1  ;;  %1708 = vmatprep.mubr.bf16.mxu0 %v1601_v11 }
 0x1d7   : > { %v1176_v26 = vadd.f32 %v1175_v25, %v2930_v32  ;;  %v1177_v27 = vpop.f32.mrb[75].mxu1  ;;  %1709 = vmatmul.mubr.bf16.gmra.mrb[68].mxu0 %v1600_v10  ;;  %v1478_v28 = vmax.f32 %v1172_v16, 0.0 }
 0x1d8   : > { %v1178_v58 = vadd.f32 %v1177_v27, %v2935_v29  ;;  %v1479_v52 = vmax.f32 %v1174_v23, 0.0 }
 0x1d9   : > { %v1480_v31 = vmax.f32 %v1176_v26, 0.0  ;;  %1440 = vmatmul.mubr.bf16.gmra.mrb[180].mxu1 %v2880_v48 }
 0x1da   : > { %v1481_v33 = vmax.f32 %v1178_v58, 0.0  ;;  %1449 = vmatprep.mubr.bf16.mxu1 %v2894_v44 }
 0x1db   : > { %v1602_v35 = vpack.c.bf16 %v1480_v31, %v1478_v28 }
 0x1dc   : > { %v1603_v36 = vpack.c.bf16 %v1481_v33, %v1479_v52  ;;  %v1181_v40 = vpop.f32.mrb[76].mxu1 }
 0x1dd   : > { %v1182_v46 = vadd.f32 %v1181_v40, %v2930_v32  ;;  %v1183_v47 = vpop.f32.mrb[77].mxu1 }
 0x1de   : > { %v1184_v49 = vadd.f32 %v1183_v47, %v2935_v29  ;;  %v1185_v51 = vpop.f32.mrb[78].mxu1  ;;  %1716 = vmatprep.mubr.bf16.mxu0 %v1603_v36 }
 0x1df   : > { %v1186_v54 = vadd.f32 %v1185_v51, %v2930_v32  ;;  %v1187_v55 = vpop.f32.mrb[79].mxu1  ;;  %1717 = vmatmul.mubr.bf16.gmra.mrb[72].mxu0 %v1602_v35  ;;  %v1482_v56 = vmax.f32 %v1182_v46, 0.0 }
 0x1e0   : > { %v1188_v48 = vadd.f32 %v1187_v55, %v2935_v29  ;;  %v1483_v44 = vmax.f32 %v1184_v49, 0.0 }
 0x1e1   : > { %v1484_v59 = vmax.f32 %v1186_v54, 0.0  ;;  %1450 = vmatmul.mubr.bf16.gmra.mrb[184].mxu1 %v2892_v39 }
 0x1e2   : > { %v1485_v61 = vmax.f32 %v1188_v48, 0.0  ;;  %1459 = vmatprep.mubr.bf16.mxu1 %v2903_v8 }
 0x1e3   : > { %v1604_v0 = vpack.c.bf16 %v1484_v59, %v1482_v56 }
 0x1e4   : > { %v1605_v2 = vpack.c.bf16 %v1485_v61, %v1483_v44  ;;  %v1191_v6 = vpop.f32.mrb[80].mxu1 }
 0x1e5   : > { %v1192_v30 = vadd.f32 %v1191_v6, %v2930_v32  ;;  %v1193_v34 = vpop.f32.mrb[81].mxu1 }
 0x1e6   : > { %v1194_v1 = vadd.f32 %v1193_v34, %v2935_v29  ;;  %v1195_v5 = vpop.f32.mrb[82].mxu1  ;;  %1724 = vmatprep.mubr.bf16.mxu0 %v1605_v2 }
 0x1e7   : > { %v1196_v42 = vadd.f32 %v1195_v5, %v2930_v32  ;;  %v1197_v45 = vpop.f32.mrb[83].mxu1  ;;  %1725 = vmatmul.mubr.bf16.gmra.mrb[76].mxu0 %v1604_v0  ;;  %v1486_v14 = vmax.f32 %v1192_v30, 0.0 }
 0x1e8   : > { %v1198_v39 = vadd.f32 %v1197_v45, %v2935_v29  ;;  %v1487_v8 = vmax.f32 %v1194_v1, 0.0 }
 0x1e9   : > { %v1488_v17 = vmax.f32 %v1196_v42, 0.0  ;;  %1460 = vmatmul.mubr.bf16.gmra.mrb[188].mxu1 %v2901_v7 }
 0x1ea   : > { %v1489_v57 = vmax.f32 %v1198_v39, 0.0 }
 0x1eb   : > { %v1606_v60 = vpack.c.bf16 %v1488_v17, %v1486_v14 }
 0x1ec   : > { %v1607_v38 = vpack.c.bf16 %v1489_v57, %v1487_v8  ;;  %v1201_v41 = vpop.f32.mrb[84].mxu1 }
 0x1ed   : > { %v1202_v20 = vadd.f32 %v1201_v41, %v2930_v32  ;;  %v1203_v24 = vpop.f32.mrb[85].mxu1 }
 0x1ee   : > { %v1204_v15 = vadd.f32 %v1203_v24, %v2935_v29  ;;  %v1205_v19 = vpop.f32.mrb[86].mxu1  ;;  %1732 = vmatprep.mubr.bf16.mxu0 %v1607_v38 }
 0x1ef   : > { %v1206_v63 = vadd.f32 %v1205_v19, %v2930_v32  ;;  %v1207_v3 = vpop.f32.mrb[87].mxu1  ;;  %1733 = vmatmul.mubr.bf16.gmra.mrb[80].mxu0 %v1606_v60  ;;  %v1490_v53 = vmax.f32 %v1202_v20, 0.0 }
 0x1f0   : > { %v1208_v50 = vadd.f32 %v1207_v3, %v2935_v29  ;;  %v1491_v37 = vmax.f32 %v1204_v15, 0.0 }
 0x1f1   : > { %v1492_v7 = vmax.f32 %v1206_v63, 0.0 }
 0x1f2   : > { %v1493_v43 = vmax.f32 %v1208_v50, 0.0 }
 0x1f3   : > { %v1608_v13 = vpack.c.bf16 %v1492_v7, %v1490_v53 }
 0x1f4   : > { %v1609_v21 = vpack.c.bf16 %v1493_v43, %v1491_v37  ;;  %v1211_v9 = vpop.f32.mrb[88].mxu1 }
 0x1f5   : > { %v1212_v12 = vadd.f32 %v1211_v9, %v2930_v32  ;;  %v1213_v62 = vpop.f32.mrb[89].mxu1 }
 0x1f6   : > { %v1214_v10 = vadd.f32 %v1213_v62, %v2935_v29  ;;  %v1215_v11 = vpop.f32.mrb[90].mxu1  ;;  %1740 = vmatprep.mubr.bf16.mxu0 %v1609_v21 }
 0x1f7   : > { %v1216_v4 = vadd.f32 %v1215_v11, %v2930_v32  ;;  %v1217_v16 = vpop.f32.mrb[91].mxu1  ;;  %1741 = vmatmul.mubr.bf16.gmra.mrb[84].mxu0 %v1608_v13  ;;  %v1494_v23 = vmax.f32 %v1212_v12, 0.0 }
 0x1f8   : > { %v1218_v18 = vadd.f32 %v1217_v16, %v2935_v29  ;;  %v1495_v26 = vmax.f32 %v1214_v10, 0.0 }
 0x1f9   : > { %v1496_v25 = vmax.f32 %v1216_v4, 0.0 }
 0x1fa   : > { %v1497_v27 = vmax.f32 %v1218_v18, 0.0 }
 0x1fb   : > { %v1610_v58 = vpack.c.bf16 %v1496_v25, %v1494_v23 }
 0x1fc   : > { %v1611_v28 = vpack.c.bf16 %v1497_v27, %v1495_v26  ;;  %v1221_v31 = vpop.f32.mrb[92].mxu1 }
 0x1fd   : > { %v1222_v52 = vadd.f32 %v1221_v31, %v2930_v32  ;;  %v1223_v33 = vpop.f32.mrb[93].mxu1 }
 0x1fe   : > { %v1224_v35 = vadd.f32 %v1223_v33, %v2935_v29  ;;  %v1225_v36 = vpop.f32.mrb[94].mxu1  ;;  %1748 = vmatprep.mubr.bf16.mxu0 %v1611_v28 }
 0x1ff   : > { %v1226_v40 = vadd.f32 %v1225_v36, %v2930_v32  ;;  %v1227_v46 = vpop.f32.mrb[95].mxu1  ;;  %1749 = vmatmul.mubr.bf16.gmra.mrb[88].mxu0 %v1610_v58  ;;  %v1498_v49 = vmax.f32 %v1222_v52, 0.0 }
 0x200   : > { %v1228_v47 = vadd.f32 %v1227_v46, %v2935_v29  ;;  %v1499_v54 = vmax.f32 %v1224_v35, 0.0 }
 0x201   : > { %v1500_v51 = vmax.f32 %v1226_v40, 0.0 }
 0x202   : > { %v1501_v55 = vmax.f32 %v1228_v47, 0.0 }
 0x203   : > { %v1612_v48 = vpack.c.bf16 %v1500_v51, %v1498_v49 }
 0x204   : > { %v1613_v56 = vpack.c.bf16 %v1501_v55, %v1499_v54  ;;  %v1231_v59 = vpop.f32.mrb[96].mxu1 }
 0x205   : > { %v1232_v44 = vadd.f32 %v1231_v59, %v2930_v32  ;;  %v1233_v61 = vpop.f32.mrb[97].mxu1 }
 0x206   : > { %v1234_v0 = vadd.f32 %v1233_v61, %v2935_v29  ;;  %v1235_v2 = vpop.f32.mrb[98].mxu1  ;;  %1756 = vmatprep.mubr.bf16.mxu0 %v1613_v56 }
 0x207   : > { %v1236_v6 = vadd.f32 %v1235_v2, %v2930_v32  ;;  %v1237_v30 = vpop.f32.mrb[99].mxu1  ;;  %1757 = vmatmul.mubr.bf16.gmra.mrb[92].mxu0 %v1612_v48  ;;  %v1502_v1 = vmax.f32 %v1232_v44, 0.0 }
 0x208   : > { %v1238_v34 = vadd.f32 %v1237_v30, %v2935_v29  ;;  %v1503_v42 = vmax.f32 %v1234_v0, 0.0 }
 0x209   : > { %v1504_v5 = vmax.f32 %v1236_v6, 0.0 }
 0x20a   : > { %v1505_v45 = vmax.f32 %v1238_v34, 0.0 }
 0x20b   : > { %v1614_v39 = vpack.c.bf16 %v1504_v5, %v1502_v1 }
 0x20c   : > { %v1615_v14 = vpack.c.bf16 %v1505_v45, %v1503_v42  ;;  %v1241_v17 = vpop.f32.mrb[100].mxu1 }
 0x20d   : > { %v1242_v8 = vadd.f32 %v1241_v17, %v2930_v32  ;;  %v1243_v57 = vpop.f32.mrb[101].mxu1 }
 0x20e   : > { %v1244_v60 = vadd.f32 %v1243_v57, %v2935_v29  ;;  %v1245_v38 = vpop.f32.mrb[102].mxu1  ;;  %1764 = vmatprep.mubr.bf16.mxu0 %v1615_v14 }
 0x20f   : > { %v1246_v41 = vadd.f32 %v1245_v38, %v2930_v32  ;;  %v1247_v20 = vpop.f32.mrb[103].mxu1  ;;  %1765 = vmatmul.mubr.bf16.gmra.mrb[96].mxu0 %v1614_v39  ;;  %v1506_v15 = vmax.f32 %v1242_v8, 0.0 }
 0x210   : > { %v1248_v24 = vadd.f32 %v1247_v20, %v2935_v29  ;;  %v1507_v63 = vmax.f32 %v1244_v60, 0.0 }
 0x211   : > { %v1508_v19 = vmax.f32 %v1246_v41, 0.0 }
 0x212   : > { %v1509_v3 = vmax.f32 %v1248_v24, 0.0 }
 0x213   : > { %v1616_v50 = vpack.c.bf16 %v1508_v19, %v1506_v15 }
 0x214   : > { %v1617_v53 = vpack.c.bf16 %v1509_v3, %v1507_v63  ;;  %v1251_v7 = vpop.f32.mrb[104].mxu1 }
 0x215   : > { %v1252_v37 = vadd.f32 %v1251_v7, %v2930_v32  ;;  %v1253_v43 = vpop.f32.mrb[105].mxu1 }
 0x216   : > { %v1254_v13 = vadd.f32 %v1253_v43, %v2935_v29  ;;  %v1255_v21 = vpop.f32.mrb[106].mxu1  ;;  %1772 = vmatprep.mubr.bf16.mxu0 %v1617_v53 }
 0x217   : > { %v1256_v9 = vadd.f32 %v1255_v21, %v2930_v32  ;;  %v1257_v12 = vpop.f32.mrb[107].mxu1  ;;  %1773 = vmatmul.mubr.bf16.gmra.mrb[100].mxu0 %v1616_v50  ;;  %v1510_v10 = vmax.f32 %v1252_v37, 0.0 }
 0x218   : > { %v1258_v62 = vadd.f32 %v1257_v12, %v2935_v29  ;;  %v1511_v4 = vmax.f32 %v1254_v13, 0.0 }
 0x219   : > { %v1512_v11 = vmax.f32 %v1256_v9, 0.0 }
 0x21a   : > { %v1513_v16 = vmax.f32 %v1258_v62, 0.0 }
 0x21b   : > { %v1618_v18 = vpack.c.bf16 %v1512_v11, %v1510_v10 }
 0x21c   : > { %v1619_v23 = vpack.c.bf16 %v1513_v16, %v1511_v4  ;;  %v1261_v25 = vpop.f32.mrb[108].mxu1 }
 0x21d   : > { %v1262_v26 = vadd.f32 %v1261_v25, %v2930_v32  ;;  %v1263_v27 = vpop.f32.mrb[109].mxu1 }
 0x21e   : > { %v1264_v58 = vadd.f32 %v1263_v27, %v2935_v29  ;;  %v1265_v28 = vpop.f32.mrb[110].mxu1  ;;  %1780 = vmatprep.mubr.bf16.mxu0 %v1619_v23 }
 0x21f   : > { %v1266_v31 = vadd.f32 %v1265_v28, %v2930_v32  ;;  %v1267_v52 = vpop.f32.mrb[111].mxu1  ;;  %1781 = vmatmul.mubr.bf16.gmra.mrb[104].mxu0 %v1618_v18  ;;  %v1514_v35 = vmax.f32 %v1262_v26, 0.0 }
 0x220   : > { %v1268_v33 = vadd.f32 %v1267_v52, %v2935_v29  ;;  %v1515_v40 = vmax.f32 %v1264_v58, 0.0 }
 0x221   : > { %v1516_v36 = vmax.f32 %v1266_v31, 0.0 }
 0x222   : > { %v1517_v46 = vmax.f32 %v1268_v33, 0.0 }
 0x223   : > { %v1620_v47 = vpack.c.bf16 %v1516_v36, %v1514_v35 }
 0x224   : > { %v1621_v49 = vpack.c.bf16 %v1517_v46, %v1515_v40  ;;  %v1271_v51 = vpop.f32.mrb[112].mxu1 }
 0x225   : > { %v1272_v54 = vadd.f32 %v1271_v51, %v2930_v32  ;;  %v1273_v55 = vpop.f32.mrb[113].mxu1 }
 0x226   : > { %v1274_v48 = vadd.f32 %v1273_v55, %v2935_v29  ;;  %v1275_v56 = vpop.f32.mrb[114].mxu1  ;;  %1788 = vmatprep.mubr.bf16.mxu0 %v1621_v49 }
 0x227   : > { %v1276_v59 = vadd.f32 %v1275_v56, %v2930_v32  ;;  %v1277_v44 = vpop.f32.mrb[115].mxu1  ;;  %1789 = vmatmul.mubr.bf16.gmra.mrb[108].mxu0 %v1620_v47  ;;  %v1518_v0 = vmax.f32 %v1272_v54, 0.0 }
 0x228   : > { %v1278_v61 = vadd.f32 %v1277_v44, %v2935_v29  ;;  %v1519_v6 = vmax.f32 %v1274_v48, 0.0 }
 0x229   : > { %v1520_v2 = vmax.f32 %v1276_v59, 0.0 }
 0x22a   : > { %v1521_v30 = vmax.f32 %v1278_v61, 0.0 }
 0x22b   : > { %v1622_v34 = vpack.c.bf16 %v1520_v2, %v1518_v0 }
 0x22c   : > { %v1623_v1 = vpack.c.bf16 %v1521_v30, %v1519_v6  ;;  %v1281_v5 = vpop.f32.mrb[116].mxu1 }
 0x22d   : > { %v1282_v42 = vadd.f32 %v1281_v5, %v2930_v32  ;;  %v1283_v45 = vpop.f32.mrb[117].mxu1 }
 0x22e   : > { %v1284_v39 = vadd.f32 %v1283_v45, %v2935_v29  ;;  %v1285_v14 = vpop.f32.mrb[118].mxu1  ;;  %1796 = vmatprep.mubr.bf16.mxu0 %v1623_v1 }
 0x22f   : > { %v1286_v17 = vadd.f32 %v1285_v14, %v2930_v32  ;;  %v1287_v8 = vpop.f32.mrb[119].mxu1  ;;  %1797 = vmatmul.mubr.bf16.gmra.mrb[112].mxu0 %v1622_v34  ;;  %v1522_v60 = vmax.f32 %v1282_v42, 0.0 }
 0x230   : > { %v1288_v57 = vadd.f32 %v1287_v8, %v2935_v29  ;;  %v1523_v41 = vmax.f32 %v1284_v39, 0.0 }
 0x231   : > { %v1524_v38 = vmax.f32 %v1286_v17, 0.0 }
 0x232   : > { %v1525_v20 = vmax.f32 %v1288_v57, 0.0 }
 0x233   : > { %v1624_v24 = vpack.c.bf16 %v1524_v38, %v1522_v60 }
 0x234   : > { %v1625_v15 = vpack.c.bf16 %v1525_v20, %v1523_v41  ;;  %v1291_v19 = vpop.f32.mrb[120].mxu1 }
 0x235   : > { %v1292_v63 = vadd.f32 %v1291_v19, %v2930_v32  ;;  %v1293_v3 = vpop.f32.mrb[121].mxu1 }
 0x236   : > { %v1294_v50 = vadd.f32 %v1293_v3, %v2935_v29  ;;  %v1295_v53 = vpop.f32.mrb[122].mxu1  ;;  %1804 = vmatprep.mubr.bf16.mxu0 %v1625_v15 }
 0x237   : > { %v1296_v7 = vadd.f32 %v1295_v53, %v2930_v32  ;;  %v1297_v37 = vpop.f32.mrb[123].mxu1  ;;  %1805 = vmatmul.mubr.bf16.gmra.mrb[116].mxu0 %v1624_v24  ;;  %v1526_v13 = vmax.f32 %v1292_v63, 0.0 }
 0x238   : > { %v1298_v43 = vadd.f32 %v1297_v37, %v2935_v29  ;;  %v1527_v9 = vmax.f32 %v1294_v50, 0.0 }
 0x239   : > { %v1528_v21 = vmax.f32 %v1296_v7, 0.0 }
 0x23a   : > { %v1529_v12 = vmax.f32 %v1298_v43, 0.0 }
 0x23b   : > { %v1626_v62 = vpack.c.bf16 %v1528_v21, %v1526_v13 }
 0x23c   : > { %v1627_v10 = vpack.c.bf16 %v1529_v12, %v1527_v9  ;;  %v1301_v11 = vpop.f32.mrb[124].mxu1 }
 0x23d   : > { %v1302_v4 = vadd.f32 %v1301_v11, %v2930_v32  ;;  %v1303_v16 = vpop.f32.mrb[125].mxu1 }
 0x23e   : > { %v1304_v18 = vadd.f32 %v1303_v16, %v2935_v29  ;;  %v1305_v23 = vpop.f32.mrb[126].mxu1  ;;  %1812 = vmatprep.mubr.bf16.mxu0 %v1627_v10 }
 0x23f   : > { %v1306_v25 = vadd.f32 %v1305_v23, %v2930_v32  ;;  %v1307_v26 = vpop.f32.mrb[127].mxu1  ;;  %1813 = vmatmul.mubr.bf16.gmra.mrb[120].mxu0 %v1626_v62  ;;  %v1530_v58 = vmax.f32 %v1302_v4, 0.0 }
 0x240   : > { %v1308_v27 = vadd.f32 %v1307_v26, %v2935_v29  ;;  %v1531_v31 = vmax.f32 %v1304_v18, 0.0 }
 0x241   : > { %v1532_v28 = vmax.f32 %v1306_v25, 0.0 }
 0x242   : > { %v1533_v52 = vmax.f32 %v1308_v27, 0.0 }
 0x243   : > { %v1628_v33 = vpack.c.bf16 %v1532_v28, %v1530_v58 }
 0x244   : > { %v1629_v35 = vpack.c.bf16 %v1533_v52, %v1531_v31  ;;  %v1311_v36 = vpop.f32.mrb[128].mxu1 }
 0x245   : > { %v1312_v40 = vadd.f32 %v1311_v36, %v2930_v32  ;;  %v1313_v46 = vpop.f32.mrb[129].mxu1 }
 0x246   : > { %v1314_v47 = vadd.f32 %v1313_v46, %v2935_v29  ;;  %v1315_v49 = vpop.f32.mrb[130].mxu1  ;;  %1820 = vmatprep.mubr.bf16.mxu0 %v1629_v35 }
 0x247   : > { %v1316_v51 = vadd.f32 %v1315_v49, %v2930_v32  ;;  %v1317_v54 = vpop.f32.mrb[131].mxu1  ;;  %1821 = vmatmul.mubr.bf16.gmra.mrb[124].mxu0 %v1628_v33  ;;  %v1534_v48 = vmax.f32 %v1312_v40, 0.0 }
 0x248   : > { %v1318_v55 = vadd.f32 %v1317_v54, %v2935_v29  ;;  %v1535_v59 = vmax.f32 %v1314_v47, 0.0 }
 0x249   : > { %v1536_v56 = vmax.f32 %v1316_v51, 0.0 }
 0x24a   : > { %v1537_v44 = vmax.f32 %v1318_v55, 0.0 }
 0x24b   : > { %v1630_v61 = vpack.c.bf16 %v1536_v56, %v1534_v48 }
 0x24c   : > { %v1631_v0 = vpack.c.bf16 %v1537_v44, %v1535_v59  ;;  %v1321_v2 = vpop.f32.mrb[132].mxu1 }
 0x24d   : > { %v1322_v6 = vadd.f32 %v1321_v2, %v2930_v32  ;;  %v1323_v30 = vpop.f32.mrb[133].mxu1 }
 0x24e   : > { %v1324_v34 = vadd.f32 %v1323_v30, %v2935_v29  ;;  %v1325_v1 = vpop.f32.mrb[134].mxu1  ;;  %1828 = vmatprep.mubr.bf16.mxu0 %v1631_v0 }
 0x24f   : > { %v1326_v5 = vadd.f32 %v1325_v1, %v2930_v32  ;;  %v1327_v42 = vpop.f32.mrb[135].mxu1  ;;  %1829 = vmatmul.mubr.bf16.gmra.mrb[128].mxu0 %v1630_v61  ;;  %v1538_v39 = vmax.f32 %v1322_v6, 0.0 }
 0x250   : > { %v1328_v45 = vadd.f32 %v1327_v42, %v2935_v29  ;;  %v1539_v17 = vmax.f32 %v1324_v34, 0.0 }
 0x251   : > { %v1540_v14 = vmax.f32 %v1326_v5, 0.0 }
 0x252   : > { %v1541_v8 = vmax.f32 %v1328_v45, 0.0 }
 0x253   : > { %v1632_v57 = vpack.c.bf16 %v1540_v14, %v1538_v39 }
 0x254   : > { %v1633_v60 = vpack.c.bf16 %v1541_v8, %v1539_v17  ;;  %v1331_v38 = vpop.f32.mrb[136].mxu1 }
 0x255   : > { %v1332_v41 = vadd.f32 %v1331_v38, %v2930_v32  ;;  %v1333_v20 = vpop.f32.mrb[137].mxu1 }
 0x256   : > { %v1334_v24 = vadd.f32 %v1333_v20, %v2935_v29  ;;  %v1335_v15 = vpop.f32.mrb[138].mxu1  ;;  %1836 = vmatprep.mubr.bf16.mxu0 %v1633_v60 }
 0x257   : > { %v1336_v19 = vadd.f32 %v1335_v15, %v2930_v32  ;;  %v1337_v63 = vpop.f32.mrb[139].mxu1  ;;  %1837 = vmatmul.mubr.bf16.gmra.mrb[132].mxu0 %v1632_v57  ;;  %v1542_v50 = vmax.f32 %v1332_v41, 0.0 }
 0x258   : > { %v1338_v3 = vadd.f32 %v1337_v63, %v2935_v29  ;;  %v1543_v7 = vmax.f32 %v1334_v24, 0.0 }
 0x259   : > { %v1544_v53 = vmax.f32 %v1336_v19, 0.0 }
 0x25a   : > { %v1545_v37 = vmax.f32 %v1338_v3, 0.0 }
 0x25b   : > { %v1634_v43 = vpack.c.bf16 %v1544_v53, %v1542_v50 }
 0x25c   : > { %v1635_v13 = vpack.c.bf16 %v1545_v37, %v1543_v7  ;;  %v1341_v21 = vpop.f32.mrb[140].mxu1 }
 0x25d   : > { %v1342_v9 = vadd.f32 %v1341_v21, %v2930_v32  ;;  %v1343_v12 = vpop.f32.mrb[141].mxu1 }
 0x25e   : > { %v1344_v62 = vadd.f32 %v1343_v12, %v2935_v29  ;;  %v1345_v10 = vpop.f32.mrb[142].mxu1  ;;  %1844 = vmatprep.mubr.bf16.mxu0 %v1635_v13 }
 0x25f   : > { %v1346_v11 = vadd.f32 %v1345_v10, %v2930_v32  ;;  %v1347_v4 = vpop.f32.mrb[143].mxu1  ;;  %1845 = vmatmul.mubr.bf16.gmra.mrb[136].mxu0 %v1634_v43  ;;  %v1546_v18 = vmax.f32 %v1342_v9, 0.0 }
 0x260   : > { %v1348_v16 = vadd.f32 %v1347_v4, %v2935_v29  ;;  %v1547_v25 = vmax.f32 %v1344_v62, 0.0 }
 0x261   : > { %v1548_v23 = vmax.f32 %v1346_v11, 0.0 }
 0x262   : > { %v1549_v26 = vmax.f32 %v1348_v16, 0.0 }
 0x263   : > { %v1636_v27 = vpack.c.bf16 %v1548_v23, %v1546_v18 }
 0x264   : > { %v1637_v58 = vpack.c.bf16 %v1549_v26, %v1547_v25  ;;  %v1351_v28 = vpop.f32.mrb[144].mxu1 }
 0x265   : > { %v1352_v31 = vadd.f32 %v1351_v28, %v2930_v32  ;;  %v1353_v52 = vpop.f32.mrb[145].mxu1 }
 0x266   : > { %v1354_v33 = vadd.f32 %v1353_v52, %v2935_v29  ;;  %v1355_v35 = vpop.f32.mrb[146].mxu1  ;;  %1852 = vmatprep.mubr.bf16.mxu0 %v1637_v58 }
 0x267   : > { %v1356_v36 = vadd.f32 %v1355_v35, %v2930_v32  ;;  %v1357_v40 = vpop.f32.mrb[147].mxu1  ;;  %1853 = vmatmul.mubr.bf16.gmra.mrb[140].mxu0 %v1636_v27  ;;  %v1550_v47 = vmax.f32 %v1352_v31, 0.0 }
 0x268   : > { %v1358_v46 = vadd.f32 %v1357_v40, %v2935_v29  ;;  %v1551_v51 = vmax.f32 %v1354_v33, 0.0 }
 0x269   : > { %v1552_v49 = vmax.f32 %v1356_v36, 0.0 }
 0x26a   : > { %v1553_v54 = vmax.f32 %v1358_v46, 0.0 }
 0x26b   : > { %v1638_v55 = vpack.c.bf16 %v1552_v49, %v1550_v47 }
 0x26c   : > { %v1639_v48 = vpack.c.bf16 %v1553_v54, %v1551_v51  ;;  %v1361_v56 = vpop.f32.mrb[148].mxu1 }
 0x26d   : > { %v1362_v59 = vadd.f32 %v1361_v56, %v2930_v32  ;;  %v1363_v44 = vpop.f32.mrb[149].mxu1 }
 0x26e   : > { %v1364_v61 = vadd.f32 %v1363_v44, %v2935_v29  ;;  %v1365_v0 = vpop.f32.mrb[150].mxu1  ;;  %1860 = vmatprep.mubr.bf16.mxu0 %v1639_v48 }
 0x26f   : > { %v1366_v2 = vadd.f32 %v1365_v0, %v2930_v32  ;;  %v1367_v6 = vpop.f32.mrb[151].mxu1  ;;  %1861 = vmatmul.mubr.bf16.gmra.mrb[144].mxu0 %v1638_v55  ;;  %v1554_v34 = vmax.f32 %v1362_v59, 0.0 }
 0x270   : > { %v1368_v30 = vadd.f32 %v1367_v6, %v2935_v29  ;;  %v1555_v5 = vmax.f32 %v1364_v61, 0.0 }
 0x271   : > { %v1556_v1 = vmax.f32 %v1366_v2, 0.0 }
 0x272   : > { %v1557_v42 = vmax.f32 %v1368_v30, 0.0 }
 0x273   : > { %v1640_v45 = vpack.c.bf16 %v1556_v1, %v1554_v34 }
 0x274   : > { %v1641_v39 = vpack.c.bf16 %v1557_v42, %v1555_v5  ;;  %v1371_v14 = vpop.f32.mrb[152].mxu1 }
 0x275   : > { %v1372_v17 = vadd.f32 %v1371_v14, %v2930_v32  ;;  %v1373_v8 = vpop.f32.mrb[153].mxu1 }
 0x276   : > { %v1374_v57 = vadd.f32 %v1373_v8, %v2935_v29  ;;  %v1375_v60 = vpop.f32.mrb[154].mxu1  ;;  %1868 = vmatprep.mubr.bf16.mxu0 %v1641_v39 }
 0x277   : > { %v1376_v38 = vadd.f32 %v1375_v60, %v2930_v32  ;;  %v1377_v41 = vpop.f32.mrb[155].mxu1  ;;  %1869 = vmatmul.mubr.bf16.gmra.mrb[148].mxu0 %v1640_v45  ;;  %v1558_v24 = vmax.f32 %v1372_v17, 0.0 }
 0x278   : > { %v1378_v20 = vadd.f32 %v1377_v41, %v2935_v29  ;;  %v1559_v19 = vmax.f32 %v1374_v57, 0.0 }
 0x279   : > { %v1560_v15 = vmax.f32 %v1376_v38, 0.0 }
 0x27a   : > { %v1561_v63 = vmax.f32 %v1378_v20, 0.0 }
 0x27b   : > { %v1642_v3 = vpack.c.bf16 %v1560_v15, %v1558_v24 }
 0x27c   : > { %v1643_v50 = vpack.c.bf16 %v1561_v63, %v1559_v19  ;;  %v1381_v53 = vpop.f32.mrb[156].mxu1  ;;  %v2089_v19 = vld [vmem:[%s3283_s1 + $0x430] ss:$8 sm:$0x3] }
 0x27d   : > { %v1382_v7 = vadd.f32 %v1381_v53, %v2930_v32  ;;  %v1383_v37 = vpop.f32.mrb[157].mxu1 }
 0x27e   : > { %v1384_v43 = vadd.f32 %v1383_v37, %v2935_v29  ;;  %v1385_v13 = vpop.f32.mrb[158].mxu1  ;;  %1876 = vmatprep.mubr.bf16.mxu0 %v1643_v50 }
 0x27f   : > { %v1386_v21 = vadd.f32 %v1385_v13, %v2930_v32  ;;  %v1387_v9 = vpop.f32.mrb[159].mxu1  ;;  %1877 = vmatmul.mubr.bf16.gmra.mrb[152].mxu0 %v1642_v3  ;;  %v1562_v62 = vmax.f32 %v1382_v7, 0.0 }
 0x280   : > { %v1388_v12 = vadd.f32 %v1387_v9, %v2935_v29  ;;  %v1563_v11 = vmax.f32 %v1384_v43, 0.0  ;;  %v3061_v43 = vrot.slane %v2089_v19, %v2531_v22 }
 0x281   : > { %v1564_v10 = vmax.f32 %v1386_v21, 0.0 }
 0x282   : > { %v1565_v4 = vmax.f32 %v1388_v12, 0.0 }
 0x283   : > { %v1644_v16 = vpack.c.bf16 %v1564_v10, %v1562_v62 }
 0x284   : > { %v1645_v18 = vpack.c.bf16 %v1565_v4, %v1563_v11  ;;  %v1391_v23 = vpop.f32.mrb[160].mxu1 }
 0x285   : > { %v1392_v25 = vadd.f32 %v1391_v23, %v2930_v32  ;;  %v1393_v26 = vpop.f32.mrb[161].mxu1 }
 0x286   : > { %v1394_v27 = vadd.f32 %v1393_v26, %v2935_v29  ;;  %v1395_v58 = vpop.f32.mrb[162].mxu1  ;;  %1884 = vmatprep.mubr.bf16.mxu0 %v1645_v18 }
 0x287   : > { %v1396_v28 = vadd.f32 %v1395_v58, %v2930_v32  ;;  %v1397_v31 = vpop.f32.mrb[163].mxu1  ;;  %1885 = vmatmul.mubr.bf16.gmra.mrb[156].mxu0 %v1644_v16  ;;  %v1566_v33 = vmax.f32 %v1392_v25, 0.0 }
 0x288   : > { %v1398_v52 = vadd.f32 %v1397_v31, %v2935_v29  ;;  %v1567_v36 = vmax.f32 %v1394_v27, 0.0 }
 0x289   : > { %v1568_v35 = vmax.f32 %v1396_v28, 0.0 }
 0x28a   : > { %v1569_v40 = vmax.f32 %v1398_v52, 0.0 }
 0x28b   : > { %v1646_v46 = vpack.c.bf16 %v1568_v35, %v1566_v33 }
 0x28c   : > { %v1647_v47 = vpack.c.bf16 %v1569_v40, %v1567_v36  ;;  %v1401_v49 = vpop.f32.mrb[164].mxu1 }
 0x28d   : > { %v1402_v51 = vadd.f32 %v1401_v49, %v2930_v32  ;;  %v1403_v54 = vpop.f32.mrb[165].mxu1 }
 0x28e   : > { %v1404_v55 = vadd.f32 %v1403_v54, %v2935_v29  ;;  %v1405_v48 = vpop.f32.mrb[166].mxu1  ;;  %1892 = vmatprep.mubr.bf16.mxu0 %v1647_v47 }
 0x28f   : > { %v1406_v56 = vadd.f32 %v1405_v48, %v2930_v32  ;;  %v1407_v59 = vpop.f32.mrb[167].mxu1  ;;  %1893 = vmatmul.mubr.bf16.gmra.mrb[160].mxu0 %v1646_v46  ;;  %v1570_v61 = vmax.f32 %v1402_v51, 0.0 }
 0x290   : > { %v1408_v44 = vadd.f32 %v1407_v59, %v2935_v29  ;;  %v1571_v2 = vmax.f32 %v1404_v55, 0.0 }
 0x291   : > { %v1572_v0 = vmax.f32 %v1406_v56, 0.0 }
 0x292   : > { %v1573_v6 = vmax.f32 %v1408_v44, 0.0 }
 0x293   : > { %v1648_v30 = vpack.c.bf16 %v1572_v0, %v1570_v61 }
 0x294   : > { %v1649_v34 = vpack.c.bf16 %v1573_v6, %v1571_v2  ;;  %v1411_v1 = vpop.f32.mrb[168].mxu1 }
 0x295   : > { %v1412_v5 = vadd.f32 %v1411_v1, %v2930_v32  ;;  %v1413_v42 = vpop.f32.mrb[169].mxu1 }
 0x296   : > { %v1414_v45 = vadd.f32 %v1413_v42, %v2935_v29  ;;  %v1415_v39 = vpop.f32.mrb[170].mxu1  ;;  %1900 = vmatprep.mubr.bf16.mxu0 %v1649_v34 }
 0x297   : > { %v1416_v14 = vadd.f32 %v1415_v39, %v2930_v32  ;;  %v1417_v17 = vpop.f32.mrb[171].mxu1  ;;  %1901 = vmatmul.mubr.bf16.gmra.mrb[164].mxu0 %v1648_v30  ;;  %v1574_v57 = vmax.f32 %v1412_v5, 0.0 }
 0x298   : > { %v1418_v8 = vadd.f32 %v1417_v17, %v2935_v29  ;;  %v1575_v38 = vmax.f32 %v1414_v45, 0.0 }
 0x299   : > { %v1576_v60 = vmax.f32 %v1416_v14, 0.0 }
 0x29a   : > { %v1577_v41 = vmax.f32 %v1418_v8, 0.0 }
 0x29b   : > { %v1650_v20 = vpack.c.bf16 %v1576_v60, %v1574_v57 }
 0x29c   : > { %v1651_v24 = vpack.c.bf16 %v1577_v41, %v1575_v38  ;;  %v1421_v15 = vpop.f32.mrb[172].mxu1 }
 0x29d   : > { %v1422_v63 = vadd.f32 %v1421_v15, %v2930_v32  ;;  %v1423_v3 = vpop.f32.mrb[173].mxu1 }
 0x29e   : > { %v1424_v50 = vadd.f32 %v1423_v3, %v2935_v29  ;;  %v1425_v53 = vpop.f32.mrb[174].mxu1  ;;  %1908 = vmatprep.mubr.bf16.mxu0 %v1651_v24 }
 0x29f   : > { %v1426_v7 = vadd.f32 %v1425_v53, %v2930_v32  ;;  %v1427_v37 = vpop.f32.mrb[175].mxu1  ;;  %1909 = vmatmul.mubr.bf16.gmra.mrb[168].mxu0 %v1650_v20  ;;  %v1578_v21 = vmax.f32 %v1422_v63, 0.0 }
 0x2a0   : > { %v1428_v13 = vadd.f32 %v1427_v37, %v2935_v29  ;;  %v1579_v12 = vmax.f32 %v1424_v50, 0.0 }
 0x2a1   : > { %v1580_v9 = vmax.f32 %v1426_v7, 0.0 }
 0x2a2   : > { %v1581_v62 = vmax.f32 %v1428_v13, 0.0  ;;  %v1702_v10 = vpop.f32.mrb[64].mxu0 }
 0x2a3   : > { %v1652_v11 = vpack.c.bf16 %v1580_v9, %v1578_v21  ;;  %v1703_v22 = vadd.f32 %v1702_v10, %v3061_v43  ;;  %v1704_v4 = vpop.f32.mrb[65].mxu0 }
 0x2a4   : > { %v1653_v16 = vpack.c.bf16 %v1581_v62, %v1579_v12  ;;  %v1431_v18 = vpop.f32.mrb[176].mxu1  ;;  %v1705_v23 = vpop.f32.mrb[66].mxu0 }
 0x2a5   : > { %1958 = vst.msk [vmem:[%s3069_s11] sm:$0xff] %vm1957_vm2, %v1703_v22  ;;  %v1432_v25 = vadd.f32 %v1431_v18, %v2930_v32  ;;  %v1706_v26 = vadd.f32 %v1705_v23, %v3061_v43  ;;  %v1433_v27 = vpop.f32.mrb[177].mxu1  ;;  %v1707_v58 = vpop.f32.mrb[67].mxu0 }
 0x2a6   : > { %v1434_v28 = vadd.f32 %v1433_v27, %v2935_v29  ;;  %v1435_v31 = vpop.f32.mrb[178].mxu1  ;;  %1916 = vmatprep.mubr.bf16.mxu0 %v1653_v16 }
 0x2a7   : > { %1959 = vst.msk [vmem:[%s3069_s11 + $0x8] sm:$0xff] %vm1957_vm2, %v1706_v26  ;;  %v1436_v52 = vadd.f32 %v1435_v31, %v2930_v32  ;;  %v1437_v33 = vpop.f32.mrb[179].mxu1  ;;  %1917 = vmatmul.mubr.bf16.gmra.mrb[172].mxu0 %v1652_v11  ;;  %v1582_v36 = vmax.f32 %v1432_v25, 0.0 }
 0x2a8   : > { %v1438_v35 = vadd.f32 %v1437_v33, %v2935_v29  ;;  %v1583_v46 = vmax.f32 %v1434_v28, 0.0 }
 0x2a9   : > { %v1584_v40 = vmax.f32 %v1436_v52, 0.0 }
 0x2aa   : > { %v1585_v47 = vmax.f32 %v1438_v35, 0.0  ;;  %v1710_v49 = vpop.f32.mrb[68].mxu0 }
 0x2ab   : > { %v1654_v51 = vpack.c.bf16 %v1584_v40, %v1582_v36  ;;  %v1711_v54 = vadd.f32 %v1710_v49, %v3061_v43  ;;  %v1712_v55 = vpop.f32.mrb[69].mxu0 }
 0x2ac   : > { %v1655_v48 = vpack.c.bf16 %v1585_v47, %v1583_v46  ;;  %v1441_v56 = vpop.f32.mrb[180].mxu1  ;;  %v1713_v59 = vpop.f32.mrb[70].mxu0 }
 0x2ad   : > { %1960 = vst.msk [vmem:[%s3069_s11 + $0x10] sm:$0xff] %vm1957_vm2, %v1711_v54  ;;  %v1442_v44 = vadd.f32 %v1441_v56, %v2930_v32  ;;  %v1714_v61 = vadd.f32 %v1713_v59, %v3061_v43  ;;  %v1443_v0 = vpop.f32.mrb[181].mxu1  ;;  %v1715_v2 = vpop.f32.mrb[71].mxu0 }
 0x2ae   : > { %v1444_v6 = vadd.f32 %v1443_v0, %v2935_v29  ;;  %v1445_v30 = vpop.f32.mrb[182].mxu1  ;;  %1924 = vmatprep.mubr.bf16.mxu0 %v1655_v48 }
 0x2af   : > { %1961 = vst.msk [vmem:[%s3069_s11 + $0x18] sm:$0xff] %vm1957_vm2, %v1714_v61  ;;  %v1446_v34 = vadd.f32 %v1445_v30, %v2930_v32  ;;  %v1447_v1 = vpop.f32.mrb[183].mxu1  ;;  %1925 = vmatmul.mubr.bf16.gmra.mrb[176].mxu0 %v1654_v51  ;;  %v1586_v42 = vmax.f32 %v1442_v44, 0.0 }
 0x2b0   : > { %v1448_v5 = vadd.f32 %v1447_v1, %v2935_v29  ;;  %v1587_v39 = vmax.f32 %v1444_v6, 0.0 }
 0x2b1   : > { %v1588_v45 = vmax.f32 %v1446_v34, 0.0 }
 0x2b2   : > { %v1589_v14 = vmax.f32 %v1448_v5, 0.0  ;;  %v1718_v17 = vpop.f32.mrb[72].mxu0 }
 0x2b3   : > { %v1656_v8 = vpack.c.bf16 %v1588_v45, %v1586_v42  ;;  %v1719_v57 = vadd.f32 %v1718_v17, %v3061_v43  ;;  %v1720_v60 = vpop.f32.mrb[73].mxu0 }
 0x2b4   : > { %v1657_v38 = vpack.c.bf16 %v1589_v14, %v1587_v39  ;;  %v1451_v41 = vpop.f32.mrb[184].mxu1  ;;  %v1721_v20 = vpop.f32.mrb[74].mxu0 }
 0x2b5   : > { %1962 = vst.msk [vmem:[%s3069_s11 + $0x20] sm:$0xff] %vm1957_vm2, %v1719_v57  ;;  %v1452_v24 = vadd.f32 %v1451_v41, %v2930_v32  ;;  %v1722_v15 = vadd.f32 %v1721_v20, %v3061_v43  ;;  %v1453_v19 = vpop.f32.mrb[185].mxu1  ;;  %v1723_v63 = vpop.f32.mrb[75].mxu0 }
 0x2b6   : > { %v1454_v3 = vadd.f32 %v1453_v19, %v2935_v29  ;;  %v1455_v50 = vpop.f32.mrb[186].mxu1  ;;  %1932 = vmatprep.mubr.bf16.mxu0 %v1657_v38 }
 0x2b7   : > { %1963 = vst.msk [vmem:[%s3069_s11 + $0x28] sm:$0xff] %vm1957_vm2, %v1722_v15  ;;  %v1456_v53 = vadd.f32 %v1455_v50, %v2930_v32  ;;  %v1457_v7 = vpop.f32.mrb[187].mxu1  ;;  %1933 = vmatmul.mubr.bf16.gmra.mrb[180].mxu0 %v1656_v8  ;;  %v1590_v13 = vmax.f32 %v1452_v24, 0.0 }
 0x2b8   : > { %v1458_v37 = vadd.f32 %v1457_v7, %v2935_v29  ;;  %v1591_v9 = vmax.f32 %v1454_v3, 0.0 }
 0x2b9   : > { %v1592_v21 = vmax.f32 %v1456_v53, 0.0 }
 0x2ba   : > { %v1593_v12 = vmax.f32 %v1458_v37, 0.0  ;;  %v1726_v62 = vpop.f32.mrb[76].mxu0 }
 0x2bb   : > { %v1658_v10 = vpack.c.bf16 %v1592_v21, %v1590_v13  ;;  %v1727_v11 = vadd.f32 %v1726_v62, %v3061_v43  ;;  %v1728_v22 = vpop.f32.mrb[77].mxu0 }
 0x2bc   : > { %v1659_v4 = vpack.c.bf16 %v1593_v12, %v1591_v9  ;;  %v1461_v16 = vpop.f32.mrb[188].mxu1  ;;  %v1729_v18 = vpop.f32.mrb[78].mxu0 }
 0x2bd   : > { %1964 = vst.msk [vmem:[%s3069_s11 + $0x30] sm:$0xff] %vm1957_vm2, %v1727_v11  ;;  %v1462_v23 = vadd.f32 %v1461_v16, %v2930_v32  ;;  %v1730_v25 = vadd.f32 %v1729_v18, %v3061_v43  ;;  %v1463_v26 = vpop.f32.mrb[189].mxu1  ;;  %v1731_v27 = vpop.f32.mrb[79].mxu0 }
 0x2be   : > { %v1464_v58 = vadd.f32 %v1463_v26, %v2935_v29  ;;  %v1465_v28 = vpop.f32.mrb[190].mxu1  ;;  %1940 = vmatprep.mubr.bf16.mxu0 %v1659_v4 }
 0x2bf   : > { %1965 = vst.msk [vmem:[%s3069_s11 + $0x38] sm:$0xff] %vm1957_vm2, %v1730_v25  ;;  %v1466_v31 = vadd.f32 %v1465_v28, %v2930_v32  ;;  %v1467_v52 = vpop.f32.mrb[191].mxu1  ;;  %1941 = vmatmul.mubr.bf16.gmra.mrb[184].mxu0 %v1658_v10  ;;  %v1594_v35 = vmax.f32 %v1462_v23, 0.0 }
 0x2c0   : > { %v1468_v33 = vadd.f32 %v1467_v52, %v2935_v29  ;;  %v1595_v40 = vmax.f32 %v1464_v58, 0.0 }
 0x2c1   : > { %v1596_v36 = vmax.f32 %v1466_v31, 0.0 }
 0x2c2   : > { %v1597_v46 = vmax.f32 %v1468_v33, 0.0  ;;  %v1734_v47 = vpop.f32.mrb[80].mxu0 }
 0x2c3   : > { %v1660_v49 = vpack.c.bf16 %v1596_v36, %v1594_v35  ;;  %v1735_v51 = vadd.f32 %v1734_v47, %v3061_v43  ;;  %v1736_v54 = vpop.f32.mrb[81].mxu0 }
 0x2c4   : > { %v1661_v55 = vpack.c.bf16 %v1597_v46, %v1595_v40  ;;  %v1737_v48 = vpop.f32.mrb[82].mxu0 }
 0x2c5   : > { %1966 = vst.msk [vmem:[%s3069_s11 + $0x40] sm:$0xff] %vm1957_vm2, %v1735_v51  ;;  %v1738_v32 = vadd.f32 %v1737_v48, %v3061_v43  ;;  %v1739_v56 = vpop.f32.mrb[83].mxu0 }
 0x2c6   : > { %1948 = vmatprep.mubr.bf16.mxu0 %v1661_v55 }
 0x2c7   : > { %1967 = vst.msk [vmem:[%s3069_s11 + $0x48] sm:$0xff] %vm1957_vm2, %v1738_v32  ;;  %1949 = vmatmul.mubr.bf16.gmra.mrb[188].mxu0 %v1660_v49 }
 0x2ca   : > { %v1742_v29 = vpop.f32.mrb[84].mxu0 }
 0x2cb   : > { %v1743_v59 = vadd.f32 %v1742_v29, %v3061_v43  ;;  %v1744_v44 = vpop.f32.mrb[85].mxu0 }
 0x2cc   : > { %v1745_v61 = vpop.f32.mrb[86].mxu0 }
 0x2cd   : > { %1968 = vst.msk [vmem:[%s3069_s11 + $0x50] sm:$0xff] %vm1957_vm2, %v1743_v59  ;;  %v1746_v0 = vadd.f32 %v1745_v61, %v3061_v43  ;;  %v1747_v2 = vpop.f32.mrb[87].mxu0 }
 0x2cf   : > { %1969 = vst.msk [vmem:[%s3069_s11 + $0x58] sm:$0xff] %vm1957_vm2, %v1746_v0 }
 0x2d2   : > { %v1750_v6 = vpop.f32.mrb[88].mxu0 }
 0x2d3   : > { %v1751_v30 = vadd.f32 %v1750_v6, %v3061_v43  ;;  %v1752_v34 = vpop.f32.mrb[89].mxu0 }
 0x2d4   : > { %v1753_v1 = vpop.f32.mrb[90].mxu0 }
 0x2d5   : > { %1970 = vst.msk [vmem:[%s3069_s11 + $0x60] sm:$0xff] %vm1957_vm2, %v1751_v30  ;;  %v1754_v5 = vadd.f32 %v1753_v1, %v3061_v43  ;;  %v1755_v42 = vpop.f32.mrb[91].mxu0 }
 0x2d7   : > { %1971 = vst.msk [vmem:[%s3069_s11 + $0x68] sm:$0xff] %vm1957_vm2, %v1754_v5 }
 0x2da   : > { %v1758_v45 = vpop.f32.mrb[92].mxu0 }
 0x2db   : > { %v1759_v39 = vadd.f32 %v1758_v45, %v3061_v43  ;;  %v1760_v14 = vpop.f32.mrb[93].mxu0 }
 0x2dc   : > { %v1761_v17 = vpop.f32.mrb[94].mxu0 }
 0x2dd   : > { %1972 = vst.msk [vmem:[%s3069_s11 + $0x70] sm:$0xff] %vm1957_vm2, %v1759_v39  ;;  %v1762_v8 = vadd.f32 %v1761_v17, %v3061_v43  ;;  %v1763_v57 = vpop.f32.mrb[95].mxu0 }
 0x2df   : > { %1973 = vst.msk [vmem:[%s3069_s11 + $0x78] sm:$0xff] %vm1957_vm2, %v1762_v8 }
 0x2e2   : > { %v1766_v60 = vpop.f32.mrb[96].mxu0 }
 0x2e3   : > { %v1767_v38 = vadd.f32 %v1766_v60, %v3061_v43  ;;  %v1768_v41 = vpop.f32.mrb[97].mxu0 }
 0x2e4   : > { %v1769_v20 = vpop.f32.mrb[98].mxu0 }
 0x2e5   : > { %1974 = vst.msk [vmem:[%s3069_s11 + $0x80] sm:$0xff] %vm1957_vm2, %v1767_v38  ;;  %v1770_v24 = vadd.f32 %v1769_v20, %v3061_v43  ;;  %v1771_v15 = vpop.f32.mrb[99].mxu0 }
 0x2e7   : > { %1975 = vst.msk [vmem:[%s3069_s11 + $0x88] sm:$0xff] %vm1957_vm2, %v1770_v24 }
 0x2ea   : > { %v1774_v19 = vpop.f32.mrb[100].mxu0 }
 0x2eb   : > { %v1775_v63 = vadd.f32 %v1774_v19, %v3061_v43  ;;  %v1776_v3 = vpop.f32.mrb[101].mxu0 }
 0x2ec   : > { %v1777_v50 = vpop.f32.mrb[102].mxu0 }
 0x2ed   : > { %1976 = vst.msk [vmem:[%s3069_s11 + $0x90] sm:$0xff] %vm1957_vm2, %v1775_v63  ;;  %v1778_v53 = vadd.f32 %v1777_v50, %v3061_v43  ;;  %v1779_v7 = vpop.f32.mrb[103].mxu0 }
 0x2ef   : > { %1977 = vst.msk [vmem:[%s3069_s11 + $0x98] sm:$0xff] %vm1957_vm2, %v1778_v53 }
 0x2f2   : > { %v1782_v37 = vpop.f32.mrb[104].mxu0 }
 0x2f3   : > { %v1783_v13 = vadd.f32 %v1782_v37, %v3061_v43  ;;  %v1784_v21 = vpop.f32.mrb[105].mxu0 }
 0x2f4   : > { %v1785_v9 = vpop.f32.mrb[106].mxu0 }
 0x2f5   : > { %1978 = vst.msk [vmem:[%s3069_s11 + $0xa0] sm:$0xff] %vm1957_vm2, %v1783_v13  ;;  %v1786_v12 = vadd.f32 %v1785_v9, %v3061_v43  ;;  %v1787_v62 = vpop.f32.mrb[107].mxu0 }
 0x2f7   : > { %1979 = vst.msk [vmem:[%s3069_s11 + $0xa8] sm:$0xff] %vm1957_vm2, %v1786_v12 }
 0x2fa   : > { %v1790_v10 = vpop.f32.mrb[108].mxu0 }
 0x2fb   : > { %v1791_v11 = vadd.f32 %v1790_v10, %v3061_v43  ;;  %v1792_v22 = vpop.f32.mrb[109].mxu0 }
 0x2fc   : > { %v1793_v4 = vpop.f32.mrb[110].mxu0 }
 0x2fd   : > { %1980 = vst.msk [vmem:[%s3069_s11 + $0xb0] sm:$0xff] %vm1957_vm2, %v1791_v11  ;;  %v1794_v16 = vadd.f32 %v1793_v4, %v3061_v43  ;;  %v1795_v18 = vpop.f32.mrb[111].mxu0 }
 0x2ff   : > { %1981 = vst.msk [vmem:[%s3069_s11 + $0xb8] sm:$0xff] %vm1957_vm2, %v1794_v16 }
 0x302   : > { %v1798_v23 = vpop.f32.mrb[112].mxu0 }
 0x303   : > { %v1799_v25 = vadd.f32 %v1798_v23, %v3061_v43  ;;  %v1800_v26 = vpop.f32.mrb[113].mxu0 }
 0x304   : > { %v1801_v27 = vpop.f32.mrb[114].mxu0 }
 0x305   : > { %1982 = vst.msk [vmem:[%s3069_s11 + $0xc0] sm:$0xff] %vm1957_vm2, %v1799_v25  ;;  %v1802_v58 = vadd.f32 %v1801_v27, %v3061_v43  ;;  %v1803_v28 = vpop.f32.mrb[115].mxu0 }
 0x307   : > { %1983 = vst.msk [vmem:[%s3069_s11 + $0xc8] sm:$0xff] %vm1957_vm2, %v1802_v58 }
 0x30a   : > { %v1806_v31 = vpop.f32.mrb[116].mxu0 }
 0x30b   : > { %v1807_v52 = vadd.f32 %v1806_v31, %v3061_v43  ;;  %v1808_v33 = vpop.f32.mrb[117].mxu0 }
 0x30c   : > { %v1809_v35 = vpop.f32.mrb[118].mxu0 }
 0x30d   : > { %1984 = vst.msk [vmem:[%s3069_s11 + $0xd0] sm:$0xff] %vm1957_vm2, %v1807_v52  ;;  %v1810_v36 = vadd.f32 %v1809_v35, %v3061_v43  ;;  %v1811_v40 = vpop.f32.mrb[119].mxu0 }
 0x30f   : > { %1985 = vst.msk [vmem:[%s3069_s11 + $0xd8] sm:$0xff] %vm1957_vm2, %v1810_v36 }
 0x312   : > { %v1814_v46 = vpop.f32.mrb[120].mxu0 }
 0x313   : > { %v1815_v47 = vadd.f32 %v1814_v46, %v3061_v43  ;;  %v1816_v49 = vpop.f32.mrb[121].mxu0 }
 0x314   : > { %v1817_v51 = vpop.f32.mrb[122].mxu0 }
 0x315   : > { %1986 = vst.msk [vmem:[%s3069_s11 + $0xe0] sm:$0xff] %vm1957_vm2, %v1815_v47  ;;  %v1818_v54 = vadd.f32 %v1817_v51, %v3061_v43  ;;  %v1819_v55 = vpop.f32.mrb[123].mxu0 }
 0x317   : > { %1987 = vst.msk [vmem:[%s3069_s11 + $0xe8] sm:$0xff] %vm1957_vm2, %v1818_v54 }
 0x31a   : > { %v1822_v48 = vpop.f32.mrb[124].mxu0 }
 0x31b   : > { %v1823_v32 = vadd.f32 %v1822_v48, %v3061_v43  ;;  %v1824_v56 = vpop.f32.mrb[125].mxu0 }
 0x31c   : > { %v1825_v29 = vpop.f32.mrb[126].mxu0 }
 0x31d   : > { %1988 = vst.msk [vmem:[%s3069_s11 + $0xf0] sm:$0xff] %vm1957_vm2, %v1823_v32  ;;  %v1826_v59 = vadd.f32 %v1825_v29, %v3061_v43  ;;  %v1827_v44 = vpop.f32.mrb[127].mxu0 }
 0x31f   : > { %1989 = vst.msk [vmem:[%s3069_s11 + $0xf8] sm:$0xff] %vm1957_vm2, %v1826_v59 }
 0x322   : > { %v1830_v61 = vpop.f32.mrb[128].mxu0 }
 0x323   : > { %v1831_v0 = vadd.f32 %v1830_v61, %v3061_v43  ;;  %v1832_v2 = vpop.f32.mrb[129].mxu0 }
 0x324   : > { %v1833_v6 = vpop.f32.mrb[130].mxu0 }
 0x325   : > { %1990 = vst.msk [vmem:[%s3069_s11 + $0x100] sm:$0xff] %vm1957_vm2, %v1831_v0  ;;  %v1834_v30 = vadd.f32 %v1833_v6, %v3061_v43  ;;  %v1835_v34 = vpop.f32.mrb[131].mxu0 }
 0x327   : > { %1991 = vst.msk [vmem:[%s3069_s11 + $0x108] sm:$0xff] %vm1957_vm2, %v1834_v30 }
 0x32a   : > { %v1838_v1 = vpop.f32.mrb[132].mxu0 }
 0x32b   : > { %v1839_v5 = vadd.f32 %v1838_v1, %v3061_v43  ;;  %v1840_v42 = vpop.f32.mrb[133].mxu0 }
 0x32c   : > { %v1841_v45 = vpop.f32.mrb[134].mxu0 }
 0x32d   : > { %1992 = vst.msk [vmem:[%s3069_s11 + $0x110] sm:$0xff] %vm1957_vm2, %v1839_v5  ;;  %v1842_v39 = vadd.f32 %v1841_v45, %v3061_v43  ;;  %v1843_v14 = vpop.f32.mrb[135].mxu0 }
 0x32f   : > { %1993 = vst.msk [vmem:[%s3069_s11 + $0x118] sm:$0xff] %vm1957_vm2, %v1842_v39 }
 0x332   : > { %v1846_v17 = vpop.f32.mrb[136].mxu0 }
 0x333   : > { %v1847_v8 = vadd.f32 %v1846_v17, %v3061_v43  ;;  %v1848_v57 = vpop.f32.mrb[137].mxu0 }
 0x334   : > { %v1849_v60 = vpop.f32.mrb[138].mxu0 }
 0x335   : > { %1994 = vst.msk [vmem:[%s3069_s11 + $0x120] sm:$0xff] %vm1957_vm2, %v1847_v8  ;;  %v1850_v38 = vadd.f32 %v1849_v60, %v3061_v43  ;;  %v1851_v41 = vpop.f32.mrb[139].mxu0 }
 0x337   : > { %1995 = vst.msk [vmem:[%s3069_s11 + $0x128] sm:$0xff] %vm1957_vm2, %v1850_v38 }
 0x33a   : > { %v1854_v20 = vpop.f32.mrb[140].mxu0 }
 0x33b   : > { %v1855_v24 = vadd.f32 %v1854_v20, %v3061_v43  ;;  %v1856_v15 = vpop.f32.mrb[141].mxu0 }
 0x33c   : > { %v1857_v19 = vpop.f32.mrb[142].mxu0 }
 0x33d   : > { %1996 = vst.msk [vmem:[%s3069_s11 + $0x130] sm:$0xff] %vm1957_vm2, %v1855_v24  ;;  %v1858_v63 = vadd.f32 %v1857_v19, %v3061_v43  ;;  %v1859_v3 = vpop.f32.mrb[143].mxu0 }
 0x33f   : > { %1997 = vst.msk [vmem:[%s3069_s11 + $0x138] sm:$0xff] %vm1957_vm2, %v1858_v63 }
 0x342   : > { %v1862_v50 = vpop.f32.mrb[144].mxu0 }
 0x343   : > { %v1863_v53 = vadd.f32 %v1862_v50, %v3061_v43  ;;  %v1864_v7 = vpop.f32.mrb[145].mxu0 }
 0x344   : > { %v1865_v37 = vpop.f32.mrb[146].mxu0 }
 0x345   : > { %1998 = vst.msk [vmem:[%s3069_s11 + $0x140] sm:$0xff] %vm1957_vm2, %v1863_v53  ;;  %v1866_v13 = vadd.f32 %v1865_v37, %v3061_v43  ;;  %v1867_v21 = vpop.f32.mrb[147].mxu0 }
 0x347   : > { %1999 = vst.msk [vmem:[%s3069_s11 + $0x148] sm:$0xff] %vm1957_vm2, %v1866_v13 }
 0x34a   : > { %v1870_v9 = vpop.f32.mrb[148].mxu0 }
 0x34b   : > { %v1871_v12 = vadd.f32 %v1870_v9, %v3061_v43  ;;  %v1872_v62 = vpop.f32.mrb[149].mxu0 }
 0x34c   : > { %v1873_v10 = vpop.f32.mrb[150].mxu0 }
 0x34d   : > { %2000 = vst.msk [vmem:[%s3069_s11 + $0x150] sm:$0xff] %vm1957_vm2, %v1871_v12  ;;  %v1874_v11 = vadd.f32 %v1873_v10, %v3061_v43  ;;  %v1875_v22 = vpop.f32.mrb[151].mxu0 }
 0x34f   : > { %2001 = vst.msk [vmem:[%s3069_s11 + $0x158] sm:$0xff] %vm1957_vm2, %v1874_v11 }
 0x352   : > { %v1878_v4 = vpop.f32.mrb[152].mxu0 }
 0x353   : > { %v1879_v16 = vadd.f32 %v1878_v4, %v3061_v43  ;;  %v1880_v18 = vpop.f32.mrb[153].mxu0 }
 0x354   : > { %v1881_v23 = vpop.f32.mrb[154].mxu0 }
 0x355   : > { %2002 = vst.msk [vmem:[%s3069_s11 + $0x160] sm:$0xff] %vm1957_vm2, %v1879_v16  ;;  %v1882_v25 = vadd.f32 %v1881_v23, %v3061_v43  ;;  %v1883_v26 = vpop.f32.mrb[155].mxu0 }
 0x357   : > { %2003 = vst.msk [vmem:[%s3069_s11 + $0x168] sm:$0xff] %vm1957_vm2, %v1882_v25 }
 0x35a   : > { %v1886_v27 = vpop.f32.mrb[156].mxu0 }
 0x35b   : > { %v1887_v58 = vadd.f32 %v1886_v27, %v3061_v43  ;;  %v1888_v28 = vpop.f32.mrb[157].mxu0 }
 0x35c   : > { %v1889_v31 = vpop.f32.mrb[158].mxu0 }
 0x35d   : > { %2004 = vst.msk [vmem:[%s3069_s11 + $0x170] sm:$0xff] %vm1957_vm2, %v1887_v58  ;;  %v1890_v52 = vadd.f32 %v1889_v31, %v3061_v43  ;;  %v1891_v33 = vpop.f32.mrb[159].mxu0 }
 0x35f   : > { %2005 = vst.msk [vmem:[%s3069_s11 + $0x178] sm:$0xff] %vm1957_vm2, %v1890_v52 }
 0x362   : > { %v1894_v35 = vpop.f32.mrb[160].mxu0 }
 0x363   : > { %v1895_v36 = vadd.f32 %v1894_v35, %v3061_v43  ;;  %v1896_v40 = vpop.f32.mrb[161].mxu0 }
 0x364   : > { %v1897_v46 = vpop.f32.mrb[162].mxu0 }
 0x365   : > { %2006 = vst.msk [vmem:[%s3069_s11 + $0x180] sm:$0xff] %vm1957_vm2, %v1895_v36  ;;  %v1898_v47 = vadd.f32 %v1897_v46, %v3061_v43  ;;  %v1899_v49 = vpop.f32.mrb[163].mxu0 }
 0x367   : > { %2007 = vst.msk [vmem:[%s3069_s11 + $0x188] sm:$0xff] %vm1957_vm2, %v1898_v47 }
 0x36a   : > { %v1902_v51 = vpop.f32.mrb[164].mxu0 }
 0x36b   : > { %v1903_v54 = vadd.f32 %v1902_v51, %v3061_v43  ;;  %v1904_v55 = vpop.f32.mrb[165].mxu0 }
 0x36c   : > { %v1905_v48 = vpop.f32.mrb[166].mxu0 }
 0x36d   : > { %2008 = vst.msk [vmem:[%s3069_s11 + $0x190] sm:$0xff] %vm1957_vm2, %v1903_v54  ;;  %v1906_v32 = vadd.f32 %v1905_v48, %v3061_v43  ;;  %v1907_v56 = vpop.f32.mrb[167].mxu0 }
 0x36f   : > { %2009 = vst.msk [vmem:[%s3069_s11 + $0x198] sm:$0xff] %vm1957_vm2, %v1906_v32 }
 0x372   : > { %v1910_v29 = vpop.f32.mrb[168].mxu0 }
 0x373   : > { %v1911_v59 = vadd.f32 %v1910_v29, %v3061_v43  ;;  %v1912_v44 = vpop.f32.mrb[169].mxu0 }
 0x374   : > { %v1913_v61 = vpop.f32.mrb[170].mxu0 }
 0x375   : > { %2010 = vst.msk [vmem:[%s3069_s11 + $0x1a0] sm:$0xff] %vm1957_vm2, %v1911_v59  ;;  %v1914_v0 = vadd.f32 %v1913_v61, %v3061_v43  ;;  %v1915_v2 = vpop.f32.mrb[171].mxu0 }
 0x377   : > { %2011 = vst.msk [vmem:[%s3069_s11 + $0x1a8] sm:$0xff] %vm1957_vm2, %v1914_v0 }
 0x37a   : > { %v1918_v6 = vpop.f32.mrb[172].mxu0 }
 0x37b   : > { %v1919_v30 = vadd.f32 %v1918_v6, %v3061_v43  ;;  %v1920_v34 = vpop.f32.mrb[173].mxu0 }
 0x37c   : > { %v1921_v1 = vpop.f32.mrb[174].mxu0 }
 0x37d   : > { %2012 = vst.msk [vmem:[%s3069_s11 + $0x1b0] sm:$0xff] %vm1957_vm2, %v1919_v30  ;;  %v1922_v5 = vadd.f32 %v1921_v1, %v3061_v43  ;;  %v1923_v42 = vpop.f32.mrb[175].mxu0 }
 0x37f   : > { %2013 = vst.msk [vmem:[%s3069_s11 + $0x1b8] sm:$0xff] %vm1957_vm2, %v1922_v5 }
 0x382   : > { %v1926_v45 = vpop.f32.mrb[176].mxu0 }
 0x383   : > { %v1927_v39 = vadd.f32 %v1926_v45, %v3061_v43  ;;  %v1928_v14 = vpop.f32.mrb[177].mxu0 }
 0x384   : > { %v1929_v17 = vpop.f32.mrb[178].mxu0 }
 0x385   : > { %2014 = vst.msk [vmem:[%s3069_s11 + $0x1c0] sm:$0xff] %vm1957_vm2, %v1927_v39  ;;  %v1930_v8 = vadd.f32 %v1929_v17, %v3061_v43  ;;  %v1931_v57 = vpop.f32.mrb[179].mxu0 }
 0x387   : > { %2015 = vst.msk [vmem:[%s3069_s11 + $0x1c8] sm:$0xff] %vm1957_vm2, %v1930_v8 }
 0x38a   : > { %v1934_v60 = vpop.f32.mrb[180].mxu0 }
 0x38b   : > { %v1935_v38 = vadd.f32 %v1934_v60, %v3061_v43  ;;  %v1936_v41 = vpop.f32.mrb[181].mxu0 }
 0x38c   : > { %v1937_v20 = vpop.f32.mrb[182].mxu0 }
 0x38d   : > { %2016 = vst.msk [vmem:[%s3069_s11 + $0x1d0] sm:$0xff] %vm1957_vm2, %v1935_v38  ;;  %v1938_v24 = vadd.f32 %v1937_v20, %v3061_v43  ;;  %v1939_v15 = vpop.f32.mrb[183].mxu0 }
 0x38f   : > { %2017 = vst.msk [vmem:[%s3069_s11 + $0x1d8] sm:$0xff] %vm1957_vm2, %v1938_v24 }
 0x392   : > { %v1942_v19 = vpop.f32.mrb[184].mxu0 }
 0x393   : > { %v1943_v63 = vadd.f32 %v1942_v19, %v3061_v43  ;;  %v1944_v3 = vpop.f32.mrb[185].mxu0 }
 0x394   : > { %v1945_v50 = vpop.f32.mrb[186].mxu0 }
 0x395   : > { %2018 = vst.msk [vmem:[%s3069_s11 + $0x1e0] sm:$0xff] %vm1957_vm2, %v1943_v63  ;;  %v1946_v53 = vadd.f32 %v1945_v50, %v3061_v43  ;;  %v1947_v7 = vpop.f32.mrb[187].mxu0 }
 0x397   : > { %2019 = vst.msk [vmem:[%s3069_s11 + $0x1e8] sm:$0xff] %vm1957_vm2, %v1946_v53 }
 0x39a   : > { %v1950_v37 = vpop.f32.mrb[188].mxu0 }
 0x39b   : > { %v1951_v13 = vadd.f32 %v1950_v37, %v3061_v43  ;;  %v1952_v21 = vpop.f32.mrb[189].mxu0 }
 0x39c   : > { %v1953_v9 = vpop.f32.mrb[190].mxu0 }
 0x39d   : > { %2020 = vst.msk [vmem:[%s3069_s11 + $0x1f0] sm:$0xff] %vm1957_vm2, %v1951_v13  ;;  %v1954_v12 = vadd.f32 %v1953_v9, %v3061_v43  ;;  %v1955_v62 = vpop.f32.mrb[191].mxu0 }
 0x39f   : > { %2021 = vst.msk [vmem:[%s3069_s11 + $0x1f8] sm:$0xff] %vm1957_vm2, %v1954_v12 }
 0x3a0 PF: > { %s12_s9 = sadd.s32 1, %s2142_s9  }
 0x3a1   : > { %p9_p4 = scmp.ge.s32.totalorder %s12_s9, 4  }
 0x3a3   :  { %11 = sbr.rel (!%p9_p4) target bundleno = 1 (0x1), region = 61 }

</bundles_post_ra>
